<compile_context>
chip_gen: v7x
topology: tpu7x:2x2x1
jax: 0.10.0
libtpu: 0.0.40
codegen_flags: <defaults>
</compile_context>

<pallas_src>
import jax
import jax.numpy as jnp
from jax import lax
from jax.experimental import pallas as pl
from jax.experimental.pallas import tpu as pltpu

NUM_LAYERS = 20
LANE = 128
SUBLANE = 8
# If 2x the full (padded) weight stack exceeds this, switch to per-layer streaming.
_FUSED_VMEM_BUDGET = 16 * 1024 * 1024


def _round_up(x, m):
    return (x + m - 1) // m * m


# --------------------------------------------------------------------------
# Kernel A: whole weight stack resident in VMEM, layer chain fully unrolled.
#   x_ref: (TB, F)   w_ref: (L, F, F)   b_ref: (L, 1, F)   o_ref: (TB, F)
# --------------------------------------------------------------------------
def _fused_kernel(x_ref, w_ref, b_ref, o_ref):
    def body(i, h):
        return jnp.dot(h, w_ref[i], preferred_element_type=jnp.float32) + b_ref[i]

    h = lax.fori_loop(0, NUM_LAYERS, body, x_ref[...].astype(jnp.float32),
                      unroll=True)
    o_ref[...] = h.astype(o_ref.dtype)


# --------------------------------------------------------------------------
# Kernel B: per-layer weight streaming.  grid = (batch_tiles, NUM_LAYERS);
# the layer axis is innermost, so for each batch tile all 20 layers run in
# sequence while BlockSpec double-buffers the next layer's weights.
#   x_ref: (TB, F)   w_ref: (1, F, F)   b_ref: (1, 1, F)   o_ref: (TB, F)
#   h_ref: VMEM (TB, F) f32 scratch carrying the activation across layers.
# --------------------------------------------------------------------------
def _stream_kernel(x_ref, w_ref, b_ref, o_ref, h_ref):
    layer = pl.program_id(1)

    @pl.when(layer == 0)
    def _():
        h_ref[...] = x_ref[...].astype(jnp.float32)

    h_ref[...] = (jnp.dot(h_ref[...], w_ref[0],
                          preferred_element_type=jnp.float32) + b_ref[0])

    @pl.when(layer == pl.num_programs(1) - 1)
    def _():
        o_ref[...] = h_ref[...].astype(o_ref.dtype)


@jax.jit
def default_model_forward(x, w_stack, b_stack):
    """x: (B, F) f32; w_stack: (L, F, F) in (in, out) layout; b_stack: (L, F)."""
    B, F = x.shape
    L = w_stack.shape[0]

    # Pad to lane/sublane-dense shapes (zero padding is preserved by the chain:
    # padded weight columns and padded bias entries are zero, so padded
    # activation lanes stay zero through every layer).
    Fp = _round_up(max(F, LANE), LANE)
    Bp = _round_up(max(B, SUBLANE), SUBLANE)
    TB = Bp if Bp <= 256 else 256
    Bp = _round_up(Bp, TB)
    nb = Bp // TB

    x_p = jnp.pad(x, ((0, Bp - B), (0, Fp - F)))
    w_p = jnp.pad(w_stack, ((0, 0), (0, Fp - F), (0, Fp - F)))
    b_p = jnp.pad(b_stack, ((0, 0), (0, Fp - F))).reshape(L, 1, Fp)

    weight_bytes = L * Fp * Fp * 4
    fused_fits = (2 * weight_bytes + 4 * TB * Fp * 4) <= _FUSED_VMEM_BUDGET

    if fused_fits:
        cost = pl.CostEstimate(
            flops=2 * L * Bp * Fp * Fp,
            transcendentals=0,
            bytes_accessed=weight_bytes + L * Fp * 4 + 2 * Bp * Fp * 4,
        )
        out = pl.pallas_call(
            _fused_kernel,
            out_shape=jax.ShapeDtypeStruct((Bp, Fp), x.dtype),
            grid=(nb,),
            in_specs=[
                pl.BlockSpec((TB, Fp), lambda i: (i, 0)),
                pl.BlockSpec((L, Fp, Fp), lambda i: (0, 0, 0)),
                pl.BlockSpec((L, 1, Fp), lambda i: (0, 0, 0)),
            ],
            out_specs=pl.BlockSpec((TB, Fp), lambda i: (i, 0)),
            compiler_params=pltpu.CompilerParams(
                dimension_semantics=("parallel",)),
            cost_estimate=cost,
        )(x_p, w_p, b_p)
    else:
        # Weights are re-streamed once per batch tile.
        cost = pl.CostEstimate(
            flops=2 * L * Bp * Fp * Fp,
            transcendentals=0,
            bytes_accessed=nb * (weight_bytes + L * Fp * 4) + 2 * Bp * Fp * 4,
        )
        # 2x weight tiles (double-buffer) + in/out double-buffers + scratch + bias.
        vmem_need = (2 * Fp * Fp * 4 + 4 * TB * Fp * 4 + TB * Fp * 4
                     + 2 * Fp * 4 + (2 << 20))
        vmem_limit = min(max(vmem_need, 32 << 20), 60 << 20)
        out = pl.pallas_call(
            _stream_kernel,
            out_shape=jax.ShapeDtypeStruct((Bp, Fp), x.dtype),
            grid=(nb, L),
            in_specs=[
                pl.BlockSpec((TB, Fp), lambda i, l: (i, 0)),
                pl.BlockSpec((1, Fp, Fp), lambda i, l: (l, 0, 0)),
                pl.BlockSpec((1, 1, Fp), lambda i, l: (l, 0, 0)),
            ],
            out_specs=pl.BlockSpec((TB, Fp), lambda i, l: (i, 0)),
            scratch_shapes=[pltpu.VMEM((TB, Fp), jnp.float32)],
            compiler_params=pltpu.CompilerParams(
                dimension_semantics=("parallel", "arbitrary"),
                vmem_limit_bytes=vmem_limit),
            cost_estimate=cost,
        )(x_p, w_p, b_p)

    return out[:B, :F]


def init_params(key, path_num, in_features):
    """Deterministically build params for all branches (PyTorch-Linear-like init)."""
    F = in_features
    bound = 1.0 / jnp.sqrt(jnp.float32(F))
    branches = []
    for _p in range(path_num):
        ws, bs = [], []
        for _l in range(NUM_LAYERS):
            key, kw, kb = jax.random.split(key, 3)
            # PyTorch nn.Linear weight is (out, in); sample in that layout then
            # transpose to (in, out) for the kernel's h @ W form.
            w = jax.random.uniform(kw, (F, F), jnp.float32, -bound, bound)
            b = jax.random.uniform(kb, (F,), jnp.float32, -bound, bound)
            ws.append(w.T)
            bs.append(b)
        branches.append((jnp.stack(ws, 0), jnp.stack(bs, 0)))
    return branches


def reference_forward(x, w_stack, b_stack):
    h = x
    for i in range(NUM_LAYERS):
        h = h @ w_stack[i] + b_stack[i][None, :]
    return h


if __name__ == "__main__":
    # --- small case (matches the benchmark's toy sizes) -> fused kernel path ---
    path_num = 2
    in_features = 16
    batch = 8

    key = jax.random.PRNGKey(0)
    key, kx = jax.random.split(key)
    x = jax.random.normal(kx, (batch, in_features), jnp.float32)

    branches = init_params(key, path_num, in_features)
    selected_path = path_num - 1                 # only this branch is applied
    w_stack, b_stack = branches[selected_path]

    out = default_model_forward(x, w_stack, b_stack)
    out = jax.block_until_ready(out)
    ref = reference_forward(x, w_stack, b_stack)
    assert jnp.allclose(out, ref, atol=1e-4, rtol=1e-4), "mismatch (fused path)"

    # --- larger hidden size -> exercises the layer-streaming kernel path ---
    key2 = jax.random.PRNGKey(1)
    key2, kx2 = jax.random.split(key2)
    F2, B2 = 384, 16
    x2 = jax.random.normal(kx2, (B2, F2), jnp.float32)
    (w2, b2), = init_params(key2, 1, F2)
    out2 = jax.block_until_ready(default_model_forward(x2, w2, b2))
    ref2 = reference_forward(x2, w2, b2)
    assert jnp.allclose(out2, ref2, atol=1e-3, rtol=1e-2), "mismatch (stream path)"

    print("KERNEL_OK")
</pallas_src>

<mosaic_0001>
module attributes {stable_mosaic.version = 11 : i64} {
  func.func @_fused_kernel(%arg0: i32, %arg1: memref<8x128xf32, #tpu.memory_space<vmem>>, %arg2: memref<20x128x128xf32, #tpu.memory_space<vmem>>, %arg3: memref<20x1x128xf32, #tpu.memory_space<vmem>>, %arg4: memref<8x128xf32, #tpu.memory_space<vmem>>) attributes {dimension_semantics = [#tpu.dimension_semantics<parallel>], iteration_bounds = array<i64: 1>, scalar_prefetch = 0 : i64, scratch_operands = 0 : i64, tpu.core_type = #tpu.core_type<tc>, window_params = [{transform_indices = @transform_0, window_bounds = array<i64: 8, 128>}, {pipeline_mode = #tpu.pipeline_mode<synchronous>, transform_indices = @transform_1, window_bounds = array<i64: 20, 128, 128>}, {pipeline_mode = #tpu.pipeline_mode<synchronous>, transform_indices = @transform_2, window_bounds = array<i64: 20, 1, 128>}, {transform_indices = @transform_3, window_bounds = array<i64: 8, 128>}]} {
    %c0 = arith.constant 0 : index
    %c0_0 = arith.constant 0 : index
    %0 = vector.load %arg1[%c0, %c0_0] : memref<8x128xf32, #tpu.memory_space<vmem>>, vector<8x128xf32>
    %c0_i32 = arith.constant 0 : i32
    %1 = arith.index_cast %c0_i32 : i32 to index
    %c0_1 = arith.constant 0 : index
    %c0_2 = arith.constant 0 : index
    %2 = vector.load %arg2[%1, %c0_1, %c0_2] : memref<20x128x128xf32, #tpu.memory_space<vmem>>, vector<1x128x128xf32>
    %3 = vector.shape_cast %2 : vector<1x128x128xf32> to vector<128x128xf32>
    %cst = arith.constant dense<0.000000e+00> : vector<8x128xf32>
    %4 = tpu.matmul %0, %3, %cst {dimension_numbers = #tpu.dot_dimension_numbers<[1], [0], [0], [1], [0, 0, 1, 1], [], []>} : vector<8x128xf32>, vector<128x128xf32>, vector<8x128xf32> -> vector<8x128xf32>
    %5 = arith.index_cast %c0_i32 : i32 to index
    %c0_3 = arith.constant 0 : index
    %c0_4 = arith.constant 0 : index
    %6 = vector.load %arg3[%5, %c0_3, %c0_4] : memref<20x1x128xf32, #tpu.memory_space<vmem>>, vector<1x1x128xf32>
    %7 = vector.shape_cast %6 : vector<1x1x128xf32> to vector<1x128xf32>
    %8 = vector.broadcast %7 : vector<1x128xf32> to vector<8x128xf32>
    %9 = arith.addf %4, %8 : vector<8x128xf32>
    %c1_i32 = arith.constant 1 : i32
    %10 = arith.index_cast %c1_i32 : i32 to index
    %c0_5 = arith.constant 0 : index
    %c0_6 = arith.constant 0 : index
    %11 = vector.load %arg2[%10, %c0_5, %c0_6] : memref<20x128x128xf32, #tpu.memory_space<vmem>>, vector<1x128x128xf32>
    %12 = vector.shape_cast %11 : vector<1x128x128xf32> to vector<128x128xf32>
    %cst_7 = arith.constant dense<0.000000e+00> : vector<8x128xf32>
    %13 = tpu.matmul %9, %12, %cst_7 {dimension_numbers = #tpu.dot_dimension_numbers<[1], [0], [0], [1], [0, 0, 1, 1], [], []>} : vector<8x128xf32>, vector<128x128xf32>, vector<8x128xf32> -> vector<8x128xf32>
    %14 = arith.index_cast %c1_i32 : i32 to index
    %c0_8 = arith.constant 0 : index
    %c0_9 = arith.constant 0 : index
    %15 = vector.load %arg3[%14, %c0_8, %c0_9] : memref<20x1x128xf32, #tpu.memory_space<vmem>>, vector<1x1x128xf32>
    %16 = vector.shape_cast %15 : vector<1x1x128xf32> to vector<1x128xf32>
    %17 = vector.broadcast %16 : vector<1x128xf32> to vector<8x128xf32>
    %18 = arith.addf %13, %17 : vector<8x128xf32>
    %c2_i32 = arith.constant 2 : i32
    %19 = arith.index_cast %c2_i32 : i32 to index
    %c0_10 = arith.constant 0 : index
    %c0_11 = arith.constant 0 : index
    %20 = vector.load %arg2[%19, %c0_10, %c0_11] : memref<20x128x128xf32, #tpu.memory_space<vmem>>, vector<1x128x128xf32>
    %21 = vector.shape_cast %20 : vector<1x128x128xf32> to vector<128x128xf32>
    %cst_12 = arith.constant dense<0.000000e+00> : vector<8x128xf32>
    %22 = tpu.matmul %18, %21, %cst_12 {dimension_numbers = #tpu.dot_dimension_numbers<[1], [0], [0], [1], [0, 0, 1, 1], [], []>} : vector<8x128xf32>, vector<128x128xf32>, vector<8x128xf32> -> vector<8x128xf32>
    %23 = arith.index_cast %c2_i32 : i32 to index
    %c0_13 = arith.constant 0 : index
    %c0_14 = arith.constant 0 : index
    %24 = vector.load %arg3[%23, %c0_13, %c0_14] : memref<20x1x128xf32, #tpu.memory_space<vmem>>, vector<1x1x128xf32>
    %25 = vector.shape_cast %24 : vector<1x1x128xf32> to vector<1x128xf32>
    %26 = vector.broadcast %25 : vector<1x128xf32> to vector<8x128xf32>
    %27 = arith.addf %22, %26 : vector<8x128xf32>
    %c3_i32 = arith.constant 3 : i32
    %28 = arith.index_cast %c3_i32 : i32 to index
    %c0_15 = arith.constant 0 : index
    %c0_16 = arith.constant 0 : index
    %29 = vector.load %arg2[%28, %c0_15, %c0_16] : memref<20x128x128xf32, #tpu.memory_space<vmem>>, vector<1x128x128xf32>
    %30 = vector.shape_cast %29 : vector<1x128x128xf32> to vector<128x128xf32>
    %cst_17 = arith.constant dense<0.000000e+00> : vector<8x128xf32>
    %31 = tpu.matmul %27, %30, %cst_17 {dimension_numbers = #tpu.dot_dimension_numbers<[1], [0], [0], [1], [0, 0, 1, 1], [], []>} : vector<8x128xf32>, vector<128x128xf32>, vector<8x128xf32> -> vector<8x128xf32>
    %32 = arith.index_cast %c3_i32 : i32 to index
    %c0_18 = arith.constant 0 : index
    %c0_19 = arith.constant 0 : index
    %33 = vector.load %arg3[%32, %c0_18, %c0_19] : memref<20x1x128xf32, #tpu.memory_space<vmem>>, vector<1x1x128xf32>
    %34 = vector.shape_cast %33 : vector<1x1x128xf32> to vector<1x128xf32>
    %35 = vector.broadcast %34 : vector<1x128xf32> to vector<8x128xf32>
    %36 = arith.addf %31, %35 : vector<8x128xf32>
    %c4_i32 = arith.constant 4 : i32
    %37 = arith.index_cast %c4_i32 : i32 to index
    %c0_20 = arith.constant 0 : index
    %c0_21 = arith.constant 0 : index
    %38 = vector.load %arg2[%37, %c0_20, %c0_21] : memref<20x128x128xf32, #tpu.memory_space<vmem>>, vector<1x128x128xf32>
    %39 = vector.shape_cast %38 : vector<1x128x128xf32> to vector<128x128xf32>
    %cst_22 = arith.constant dense<0.000000e+00> : vector<8x128xf32>
    %40 = tpu.matmul %36, %39, %cst_22 {dimension_numbers = #tpu.dot_dimension_numbers<[1], [0], [0], [1], [0, 0, 1, 1], [], []>} : vector<8x128xf32>, vector<128x128xf32>, vector<8x128xf32> -> vector<8x128xf32>
    %41 = arith.index_cast %c4_i32 : i32 to index
    %c0_23 = arith.constant 0 : index
    %c0_24 = arith.constant 0 : index
    %42 = vector.load %arg3[%41, %c0_23, %c0_24] : memref<20x1x128xf32, #tpu.memory_space<vmem>>, vector<1x1x128xf32>
    %43 = vector.shape_cast %42 : vector<1x1x128xf32> to vector<1x128xf32>
    %44 = vector.broadcast %43 : vector<1x128xf32> to vector<8x128xf32>
    %45 = arith.addf %40, %44 : vector<8x128xf32>
    %c5_i32 = arith.constant 5 : i32
    %46 = arith.index_cast %c5_i32 : i32 to index
    %c0_25 = arith.constant 0 : index
    %c0_26 = arith.constant 0 : index
    %47 = vector.load %arg2[%46, %c0_25, %c0_26] : memref<20x128x128xf32, #tpu.memory_space<vmem>>, vector<1x128x128xf32>
    %48 = vector.shape_cast %47 : vector<1x128x128xf32> to vector<128x128xf32>
    %cst_27 = arith.constant dense<0.000000e+00> : vector<8x128xf32>
    %49 = tpu.matmul %45, %48, %cst_27 {dimension_numbers = #tpu.dot_dimension_numbers<[1], [0], [0], [1], [0, 0, 1, 1], [], []>} : vector<8x128xf32>, vector<128x128xf32>, vector<8x128xf32> -> vector<8x128xf32>
    %50 = arith.index_cast %c5_i32 : i32 to index
    %c0_28 = arith.constant 0 : index
    %c0_29 = arith.constant 0 : index
    %51 = vector.load %arg3[%50, %c0_28, %c0_29] : memref<20x1x128xf32, #tpu.memory_space<vmem>>, vector<1x1x128xf32>
    %52 = vector.shape_cast %51 : vector<1x1x128xf32> to vector<1x128xf32>
    %53 = vector.broadcast %52 : vector<1x128xf32> to vector<8x128xf32>
    %54 = arith.addf %49, %53 : vector<8x128xf32>
    %c6_i32 = arith.constant 6 : i32
    %55 = arith.index_cast %c6_i32 : i32 to index
    %c0_30 = arith.constant 0 : index
    %c0_31 = arith.constant 0 : index
    %56 = vector.load %arg2[%55, %c0_30, %c0_31] : memref<20x128x128xf32, #tpu.memory_space<vmem>>, vector<1x128x128xf32>
    %57 = vector.shape_cast %56 : vector<1x128x128xf32> to vector<128x128xf32>
    %cst_32 = arith.constant dense<0.000000e+00> : vector<8x128xf32>
    %58 = tpu.matmul %54, %57, %cst_32 {dimension_numbers = #tpu.dot_dimension_numbers<[1], [0], [0], [1], [0, 0, 1, 1], [], []>} : vector<8x128xf32>, vector<128x128xf32>, vector<8x128xf32> -> vector<8x128xf32>
    %59 = arith.index_cast %c6_i32 : i32 to index
    %c0_33 = arith.constant 0 : index
    %c0_34 = arith.constant 0 : index
    %60 = vector.load %arg3[%59, %c0_33, %c0_34] : memref<20x1x128xf32, #tpu.memory_space<vmem>>, vector<1x1x128xf32>
    %61 = vector.shape_cast %60 : vector<1x1x128xf32> to vector<1x128xf32>
    %62 = vector.broadcast %61 : vector<1x128xf32> to vector<8x128xf32>
    %63 = arith.addf %58, %62 : vector<8x128xf32>
    %c7_i32 = arith.constant 7 : i32
    %64 = arith.index_cast %c7_i32 : i32 to index
    %c0_35 = arith.constant 0 : index
    %c0_36 = arith.constant 0 : index
    %65 = vector.load %arg2[%64, %c0_35, %c0_36] : memref<20x128x128xf32, #tpu.memory_space<vmem>>, vector<1x128x128xf32>
    %66 = vector.shape_cast %65 : vector<1x128x128xf32> to vector<128x128xf32>
    %cst_37 = arith.constant dense<0.000000e+00> : vector<8x128xf32>
    %67 = tpu.matmul %63, %66, %cst_37 {dimension_numbers = #tpu.dot_dimension_numbers<[1], [0], [0], [1], [0, 0, 1, 1], [], []>} : vector<8x128xf32>, vector<128x128xf32>, vector<8x128xf32> -> vector<8x128xf32>
    %68 = arith.index_cast %c7_i32 : i32 to index
    %c0_38 = arith.constant 0 : index
    %c0_39 = arith.constant 0 : index
    %69 = vector.load %arg3[%68, %c0_38, %c0_39] : memref<20x1x128xf32, #tpu.memory_space<vmem>>, vector<1x1x128xf32>
    %70 = vector.shape_cast %69 : vector<1x1x128xf32> to vector<1x128xf32>
    %71 = vector.broadcast %70 : vector<1x128xf32> to vector<8x128xf32>
    %72 = arith.addf %67, %71 : vector<8x128xf32>
    %c8_i32 = arith.constant 8 : i32
    %73 = arith.index_cast %c8_i32 : i32 to index
    %c0_40 = arith.constant 0 : index
    %c0_41 = arith.constant 0 : index
    %74 = vector.load %arg2[%73, %c0_40, %c0_41] : memref<20x128x128xf32, #tpu.memory_space<vmem>>, vector<1x128x128xf32>
    %75 = vector.shape_cast %74 : vector<1x128x128xf32> to vector<128x128xf32>
    %cst_42 = arith.constant dense<0.000000e+00> : vector<8x128xf32>
    %76 = tpu.matmul %72, %75, %cst_42 {dimension_numbers = #tpu.dot_dimension_numbers<[1], [0], [0], [1], [0, 0, 1, 1], [], []>} : vector<8x128xf32>, vector<128x128xf32>, vector<8x128xf32> -> vector<8x128xf32>
    %77 = arith.index_cast %c8_i32 : i32 to index
    %c0_43 = arith.constant 0 : index
    %c0_44 = arith.constant 0 : index
    %78 = vector.load %arg3[%77, %c0_43, %c0_44] : memref<20x1x128xf32, #tpu.memory_space<vmem>>, vector<1x1x128xf32>
    %79 = vector.shape_cast %78 : vector<1x1x128xf32> to vector<1x128xf32>
    %80 = vector.broadcast %79 : vector<1x128xf32> to vector<8x128xf32>
    %81 = arith.addf %76, %80 : vector<8x128xf32>
    %c9_i32 = arith.constant 9 : i32
    %82 = arith.index_cast %c9_i32 : i32 to index
    %c0_45 = arith.constant 0 : index
    %c0_46 = arith.constant 0 : index
    %83 = vector.load %arg2[%82, %c0_45, %c0_46] : memref<20x128x128xf32, #tpu.memory_space<vmem>>, vector<1x128x128xf32>
    %84 = vector.shape_cast %83 : vector<1x128x128xf32> to vector<128x128xf32>
    %cst_47 = arith.constant dense<0.000000e+00> : vector<8x128xf32>
    %85 = tpu.matmul %81, %84, %cst_47 {dimension_numbers = #tpu.dot_dimension_numbers<[1], [0], [0], [1], [0, 0, 1, 1], [], []>} : vector<8x128xf32>, vector<128x128xf32>, vector<8x128xf32> -> vector<8x128xf32>
    %86 = arith.index_cast %c9_i32 : i32 to index
    %c0_48 = arith.constant 0 : index
    %c0_49 = arith.constant 0 : index
    %87 = vector.load %arg3[%86, %c0_48, %c0_49] : memref<20x1x128xf32, #tpu.memory_space<vmem>>, vector<1x1x128xf32>
    %88 = vector.shape_cast %87 : vector<1x1x128xf32> to vector<1x128xf32>
    %89 = vector.broadcast %88 : vector<1x128xf32> to vector<8x128xf32>
    %90 = arith.addf %85, %89 : vector<8x128xf32>
    %c10_i32 = arith.constant 10 : i32
    %91 = arith.index_cast %c10_i32 : i32 to index
    %c0_50 = arith.constant 0 : index
    %c0_51 = arith.constant 0 : index
    %92 = vector.load %arg2[%91, %c0_50, %c0_51] : memref<20x128x128xf32, #tpu.memory_space<vmem>>, vector<1x128x128xf32>
    %93 = vector.shape_cast %92 : vector<1x128x128xf32> to vector<128x128xf32>
    %cst_52 = arith.constant dense<0.000000e+00> : vector<8x128xf32>
    %94 = tpu.matmul %90, %93, %cst_52 {dimension_numbers = #tpu.dot_dimension_numbers<[1], [0], [0], [1], [0, 0, 1, 1], [], []>} : vector<8x128xf32>, vector<128x128xf32>, vector<8x128xf32> -> vector<8x128xf32>
    %95 = arith.index_cast %c10_i32 : i32 to index
    %c0_53 = arith.constant 0 : index
    %c0_54 = arith.constant 0 : index
    %96 = vector.load %arg3[%95, %c0_53, %c0_54] : memref<20x1x128xf32, #tpu.memory_space<vmem>>, vector<1x1x128xf32>
    %97 = vector.shape_cast %96 : vector<1x1x128xf32> to vector<1x128xf32>
    %98 = vector.broadcast %97 : vector<1x128xf32> to vector<8x128xf32>
    %99 = arith.addf %94, %98 : vector<8x128xf32>
    %c11_i32 = arith.constant 11 : i32
    %100 = arith.index_cast %c11_i32 : i32 to index
    %c0_55 = arith.constant 0 : index
    %c0_56 = arith.constant 0 : index
    %101 = vector.load %arg2[%100, %c0_55, %c0_56] : memref<20x128x128xf32, #tpu.memory_space<vmem>>, vector<1x128x128xf32>
    %102 = vector.shape_cast %101 : vector<1x128x128xf32> to vector<128x128xf32>
    %cst_57 = arith.constant dense<0.000000e+00> : vector<8x128xf32>
    %103 = tpu.matmul %99, %102, %cst_57 {dimension_numbers = #tpu.dot_dimension_numbers<[1], [0], [0], [1], [0, 0, 1, 1], [], []>} : vector<8x128xf32>, vector<128x128xf32>, vector<8x128xf32> -> vector<8x128xf32>
    %104 = arith.index_cast %c11_i32 : i32 to index
    %c0_58 = arith.constant 0 : index
    %c0_59 = arith.constant 0 : index
    %105 = vector.load %arg3[%104, %c0_58, %c0_59] : memref<20x1x128xf32, #tpu.memory_space<vmem>>, vector<1x1x128xf32>
    %106 = vector.shape_cast %105 : vector<1x1x128xf32> to vector<1x128xf32>
    %107 = vector.broadcast %106 : vector<1x128xf32> to vector<8x128xf32>
    %108 = arith.addf %103, %107 : vector<8x128xf32>
    %c12_i32 = arith.constant 12 : i32
    %109 = arith.index_cast %c12_i32 : i32 to index
    %c0_60 = arith.constant 0 : index
    %c0_61 = arith.constant 0 : index
    %110 = vector.load %arg2[%109, %c0_60, %c0_61] : memref<20x128x128xf32, #tpu.memory_space<vmem>>, vector<1x128x128xf32>
    %111 = vector.shape_cast %110 : vector<1x128x128xf32> to vector<128x128xf32>
    %cst_62 = arith.constant dense<0.000000e+00> : vector<8x128xf32>
    %112 = tpu.matmul %108, %111, %cst_62 {dimension_numbers = #tpu.dot_dimension_numbers<[1], [0], [0], [1], [0, 0, 1, 1], [], []>} : vector<8x128xf32>, vector<128x128xf32>, vector<8x128xf32> -> vector<8x128xf32>
    %113 = arith.index_cast %c12_i32 : i32 to index
    %c0_63 = arith.constant 0 : index
    %c0_64 = arith.constant 0 : index
    %114 = vector.load %arg3[%113, %c0_63, %c0_64] : memref<20x1x128xf32, #tpu.memory_space<vmem>>, vector<1x1x128xf32>
    %115 = vector.shape_cast %114 : vector<1x1x128xf32> to vector<1x128xf32>
    %116 = vector.broadcast %115 : vector<1x128xf32> to vector<8x128xf32>
    %117 = arith.addf %112, %116 : vector<8x128xf32>
    %c13_i32 = arith.constant 13 : i32
    %118 = arith.index_cast %c13_i32 : i32 to index
    %c0_65 = arith.constant 0 : index
    %c0_66 = arith.constant 0 : index
    %119 = vector.load %arg2[%118, %c0_65, %c0_66] : memref<20x128x128xf32, #tpu.memory_space<vmem>>, vector<1x128x128xf32>
    %120 = vector.shape_cast %119 : vector<1x128x128xf32> to vector<128x128xf32>
    %cst_67 = arith.constant dense<0.000000e+00> : vector<8x128xf32>
    %121 = tpu.matmul %117, %120, %cst_67 {dimension_numbers = #tpu.dot_dimension_numbers<[1], [0], [0], [1], [0, 0, 1, 1], [], []>} : vector<8x128xf32>, vector<128x128xf32>, vector<8x128xf32> -> vector<8x128xf32>
    %122 = arith.index_cast %c13_i32 : i32 to index
    %c0_68 = arith.constant 0 : index
    %c0_69 = arith.constant 0 : index
    %123 = vector.load %arg3[%122, %c0_68, %c0_69] : memref<20x1x128xf32, #tpu.memory_space<vmem>>, vector<1x1x128xf32>
    %124 = vector.shape_cast %123 : vector<1x1x128xf32> to vector<1x128xf32>
    %125 = vector.broadcast %124 : vector<1x128xf32> to vector<8x128xf32>
    %126 = arith.addf %121, %125 : vector<8x128xf32>
    %c14_i32 = arith.constant 14 : i32
    %127 = arith.index_cast %c14_i32 : i32 to index
    %c0_70 = arith.constant 0 : index
    %c0_71 = arith.constant 0 : index
    %128 = vector.load %arg2[%127, %c0_70, %c0_71] : memref<20x128x128xf32, #tpu.memory_space<vmem>>, vector<1x128x128xf32>
    %129 = vector.shape_cast %128 : vector<1x128x128xf32> to vector<128x128xf32>
    %cst_72 = arith.constant dense<0.000000e+00> : vector<8x128xf32>
    %130 = tpu.matmul %126, %129, %cst_72 {dimension_numbers = #tpu.dot_dimension_numbers<[1], [0], [0], [1], [0, 0, 1, 1], [], []>} : vector<8x128xf32>, vector<128x128xf32>, vector<8x128xf32> -> vector<8x128xf32>
    %131 = arith.index_cast %c14_i32 : i32 to index
    %c0_73 = arith.constant 0 : index
    %c0_74 = arith.constant 0 : index
    %132 = vector.load %arg3[%131, %c0_73, %c0_74] : memref<20x1x128xf32, #tpu.memory_space<vmem>>, vector<1x1x128xf32>
    %133 = vector.shape_cast %132 : vector<1x1x128xf32> to vector<1x128xf32>
    %134 = vector.broadcast %133 : vector<1x128xf32> to vector<8x128xf32>
    %135 = arith.addf %130, %134 : vector<8x128xf32>
    %c15_i32 = arith.constant 15 : i32
    %136 = arith.index_cast %c15_i32 : i32 to index
    %c0_75 = arith.constant 0 : index
    %c0_76 = arith.constant 0 : index
    %137 = vector.load %arg2[%136, %c0_75, %c0_76] : memref<20x128x128xf32, #tpu.memory_space<vmem>>, vector<1x128x128xf32>
    %138 = vector.shape_cast %137 : vector<1x128x128xf32> to vector<128x128xf32>
    %cst_77 = arith.constant dense<0.000000e+00> : vector<8x128xf32>
    %139 = tpu.matmul %135, %138, %cst_77 {dimension_numbers = #tpu.dot_dimension_numbers<[1], [0], [0], [1], [0, 0, 1, 1], [], []>} : vector<8x128xf32>, vector<128x128xf32>, vector<8x128xf32> -> vector<8x128xf32>
    %140 = arith.index_cast %c15_i32 : i32 to index
    %c0_78 = arith.constant 0 : index
    %c0_79 = arith.constant 0 : index
    %141 = vector.load %arg3[%140, %c0_78, %c0_79] : memref<20x1x128xf32, #tpu.memory_space<vmem>>, vector<1x1x128xf32>
    %142 = vector.shape_cast %141 : vector<1x1x128xf32> to vector<1x128xf32>
    %143 = vector.broadcast %142 : vector<1x128xf32> to vector<8x128xf32>
    %144 = arith.addf %139, %143 : vector<8x128xf32>
    %c16_i32 = arith.constant 16 : i32
    %145 = arith.index_cast %c16_i32 : i32 to index
    %c0_80 = arith.constant 0 : index
    %c0_81 = arith.constant 0 : index
    %146 = vector.load %arg2[%145, %c0_80, %c0_81] : memref<20x128x128xf32, #tpu.memory_space<vmem>>, vector<1x128x128xf32>
    %147 = vector.shape_cast %146 : vector<1x128x128xf32> to vector<128x128xf32>
    %cst_82 = arith.constant dense<0.000000e+00> : vector<8x128xf32>
    %148 = tpu.matmul %144, %147, %cst_82 {dimension_numbers = #tpu.dot_dimension_numbers<[1], [0], [0], [1], [0, 0, 1, 1], [], []>} : vector<8x128xf32>, vector<128x128xf32>, vector<8x128xf32> -> vector<8x128xf32>
    %149 = arith.index_cast %c16_i32 : i32 to index
    %c0_83 = arith.constant 0 : index
    %c0_84 = arith.constant 0 : index
    %150 = vector.load %arg3[%149, %c0_83, %c0_84] : memref<20x1x128xf32, #tpu.memory_space<vmem>>, vector<1x1x128xf32>
    %151 = vector.shape_cast %150 : vector<1x1x128xf32> to vector<1x128xf32>
    %152 = vector.broadcast %151 : vector<1x128xf32> to vector<8x128xf32>
    %153 = arith.addf %148, %152 : vector<8x128xf32>
    %c17_i32 = arith.constant 17 : i32
    %154 = arith.index_cast %c17_i32 : i32 to index
    %c0_85 = arith.constant 0 : index
    %c0_86 = arith.constant 0 : index
    %155 = vector.load %arg2[%154, %c0_85, %c0_86] : memref<20x128x128xf32, #tpu.memory_space<vmem>>, vector<1x128x128xf32>
    %156 = vector.shape_cast %155 : vector<1x128x128xf32> to vector<128x128xf32>
    %cst_87 = arith.constant dense<0.000000e+00> : vector<8x128xf32>
    %157 = tpu.matmul %153, %156, %cst_87 {dimension_numbers = #tpu.dot_dimension_numbers<[1], [0], [0], [1], [0, 0, 1, 1], [], []>} : vector<8x128xf32>, vector<128x128xf32>, vector<8x128xf32> -> vector<8x128xf32>
    %158 = arith.index_cast %c17_i32 : i32 to index
    %c0_88 = arith.constant 0 : index
    %c0_89 = arith.constant 0 : index
    %159 = vector.load %arg3[%158, %c0_88, %c0_89] : memref<20x1x128xf32, #tpu.memory_space<vmem>>, vector<1x1x128xf32>
    %160 = vector.shape_cast %159 : vector<1x1x128xf32> to vector<1x128xf32>
    %161 = vector.broadcast %160 : vector<1x128xf32> to vector<8x128xf32>
    %162 = arith.addf %157, %161 : vector<8x128xf32>
    %c18_i32 = arith.constant 18 : i32
    %163 = arith.index_cast %c18_i32 : i32 to index
    %c0_90 = arith.constant 0 : index
    %c0_91 = arith.constant 0 : index
    %164 = vector.load %arg2[%163, %c0_90, %c0_91] : memref<20x128x128xf32, #tpu.memory_space<vmem>>, vector<1x128x128xf32>
    %165 = vector.shape_cast %164 : vector<1x128x128xf32> to vector<128x128xf32>
    %cst_92 = arith.constant dense<0.000000e+00> : vector<8x128xf32>
    %166 = tpu.matmul %162, %165, %cst_92 {dimension_numbers = #tpu.dot_dimension_numbers<[1], [0], [0], [1], [0, 0, 1, 1], [], []>} : vector<8x128xf32>, vector<128x128xf32>, vector<8x128xf32> -> vector<8x128xf32>
    %167 = arith.index_cast %c18_i32 : i32 to index
    %c0_93 = arith.constant 0 : index
    %c0_94 = arith.constant 0 : index
    %168 = vector.load %arg3[%167, %c0_93, %c0_94] : memref<20x1x128xf32, #tpu.memory_space<vmem>>, vector<1x1x128xf32>
    %169 = vector.shape_cast %168 : vector<1x1x128xf32> to vector<1x128xf32>
    %170 = vector.broadcast %169 : vector<1x128xf32> to vector<8x128xf32>
    %171 = arith.addf %166, %170 : vector<8x128xf32>
    %c19_i32 = arith.constant 19 : i32
    %172 = arith.index_cast %c19_i32 : i32 to index
    %c0_95 = arith.constant 0 : index
    %c0_96 = arith.constant 0 : index
    %173 = vector.load %arg2[%172, %c0_95, %c0_96] : memref<20x128x128xf32, #tpu.memory_space<vmem>>, vector<1x128x128xf32>
    %174 = vector.shape_cast %173 : vector<1x128x128xf32> to vector<128x128xf32>
    %cst_97 = arith.constant dense<0.000000e+00> : vector<8x128xf32>
    %175 = tpu.matmul %171, %174, %cst_97 {dimension_numbers = #tpu.dot_dimension_numbers<[1], [0], [0], [1], [0, 0, 1, 1], [], []>} : vector<8x128xf32>, vector<128x128xf32>, vector<8x128xf32> -> vector<8x128xf32>
    %176 = arith.index_cast %c19_i32 : i32 to index
    %c0_98 = arith.constant 0 : index
    %c0_99 = arith.constant 0 : index
    %177 = vector.load %arg3[%176, %c0_98, %c0_99] : memref<20x1x128xf32, #tpu.memory_space<vmem>>, vector<1x1x128xf32>
    %178 = vector.shape_cast %177 : vector<1x1x128xf32> to vector<1x128xf32>
    %179 = vector.broadcast %178 : vector<1x128xf32> to vector<8x128xf32>
    %180 = arith.addf %175, %179 : vector<8x128xf32>
    %c20_i32 = arith.constant 20 : i32
    %c0_100 = arith.constant 0 : index
    %c0_101 = arith.constant 0 : index
    %181 = vector.load %arg4[%c0_100, %c0_101] : memref<8x128xf32, #tpu.memory_space<vmem>>, vector<8x128xf32>
    tpu.vector_store %arg4[%c0_100, %c0_101], %180 {strides = array<i32>} : memref<8x128xf32, #tpu.memory_space<vmem>>, vector<8x128xf32>,
    return
  }
  func.func @transform_0(%arg0: i32) -> (i32, i32) {
    %c0_i32 = arith.constant 0 : i32
    %c0_i32_0 = arith.constant 0 : i32
    return %arg0, %c0_i32 : i32, i32
  }
  func.func @transform_1(%arg0: i32) -> (i32, i32, i32) {
    %c0_i32 = arith.constant 0 : i32
    %c0_i32_0 = arith.constant 0 : i32
    %c0_i32_1 = arith.constant 0 : i32
    %c0_i32_2 = arith.constant 0 : i32
    return %c0_i32, %c0_i32_0, %c0_i32_1 : i32, i32, i32
  }
  func.func @transform_2(%arg0: i32) -> (i32, i32, i32) {
    %c0_i32 = arith.constant 0 : i32
    %c0_i32_0 = arith.constant 0 : i32
    %c0_i32_1 = arith.constant 0 : i32
    %c0_i32_2 = arith.constant 0 : i32
    return %c0_i32, %c0_i32_0, %c0_i32_1 : i32, i32, i32
  }
  func.func @transform_3(%arg0: i32) -> (i32, i32) {
    %c0_i32 = arith.constant 0 : i32
    %c0_i32_0 = arith.constant 0 : i32
    return %arg0, %c0_i32 : i32, i32
  }
}

</mosaic_0001>

<bundles_post_ra>
// kernel: default_model_forward.1
= control target key start
LH: loop header
LB: loop body
LE: loop exit
PB: predicated region body
PF: predicated region fallthrough
CT: control target
= control target key end

     0   :  { %v3820_v3 = vmov 0.0|0.0   ;;  %vm3821_vm0 = vmmov 0   ;;  %v3822_v6 = vmov 0.0   ;;  %s5079_s0 = inlined_call_operand.vmem [shape: f32[8,128], index: 0, kind: input, shape index: {}]   ;;  %s5080_s1 = inlined_call_operand.vmem [shape: f32[20,128,128], index: 1, kind: input, shape index: {}]   ;;  %s5081_s2 = inlined_call_operand.vmem [shape: f32[20,1,128], index: 2, kind: input, shape index: {}]   ;;  %s5082_s3 = inlined_call_operand.hbm [shape: f32[8,128], index: 3, kind: output, shape index: {}]  }
   0x1   :  { %v16_v0 = vld [vmem:[%s5080_s1] sm:$0xff]  ;;  %v17_v1 = vld [vmem:[%s5080_s1 + $0x8] sm:$0xff]  ;;  %v18_v2 = vld [vmem:[%s5080_s1 + $0x10] sm:$0xff]  ;;  %3312 = vmatprep.subr.bf16.mxu0 %v3820_v3  ;;  %2644 = vmatprep.mubr.msk.f32.mxu0 %vm3821_vm0, %v3822_v6 }
   0x2   :  { %v3313_v4 = vpack.c.bf16 %v17_v1, %v16_v0  ;;  %v19_v5 = vld [vmem:[%s5080_s1 + $0x18] sm:$0xff]  ;;  %3336 = vmatprep.subr.bf16.mxu1 %v3820_v3  ;;  %2679 = vmatprep.mubr.msk.f32.mxu1 %vm3821_vm0, %v3822_v6  ;;  %v20_v8 = vld [vmem:[%s5080_s1 + $0x20] sm:$0xff]  ;;  %v21_v9 = vld [vmem:[%s5080_s1 + $0x28] sm:$0xff] }
   0x3   :  { %v3316_v7 = vpack.c.bf16 %v19_v5, %v18_v2  ;;  %v1930_v10 = vld [vmem:[%s5080_s1 + $0x80] sm:$0xff]  ;;  %v1931_v11 = vld [vmem:[%s5080_s1 + $0x88] sm:$0xff]  ;;  %v1932_v12 = vld [vmem:[%s5080_s1 + $0x90] sm:$0xff]  ;;  %v3319_v14 = vpack.c.bf16 %v21_v9, %v20_v8 }
   0x4   :  { %3314 = vmatpush3.bf16.msra.mxu0 %v3313_v4  ;;  %v1933_v13 = vld [vmem:[%s5080_s1 + $0x98] sm:$0xff]  ;;  %v3337_v15 = vpack.c.bf16 %v1931_v11, %v1930_v10  ;;  %v22_v16 = vld [vmem:[%s5080_s1 + $0x30] sm:$0xff]  ;;  %v1934_v19 = vld [vmem:[%s5080_s1 + $0xa0] sm:$0xff] }
   0x5   :  { %3315 = vmatprep.subr.bf16.mxu0 %v3820_v3  ;;  %v23_v17 = vld [vmem:[%s5080_s1 + $0x38] sm:$0xff]  ;;  %v3340_v18 = vpack.c.bf16 %v1933_v13, %v1932_v12  ;;  %v1935_v20 = vld [vmem:[%s5080_s1 + $0xa8] sm:$0xff] }
   0x6   :  { %3338 = vmatpush3.bf16.msra.mxu1 %v3337_v15 }
   0x7   :  { %3339 = vmatprep.subr.bf16.mxu1 %v3820_v3 }
   0x8   :  { %3317 = vmatpush3.bf16.msra.mxu0 %v3316_v7 }
   0x9   :  { %3318 = vmatprep.subr.bf16.mxu0 %v3820_v3 }
   0xa   :  { %8 = vsyncpa [#allocation3], 0  ;;  %v3322_v21 = vpack.c.bf16 %v23_v17, %v22_v16  ;;  %v24_v22 = vld [vmem:[%s5080_s1 + $0x40] sm:$0xff]  ;;  %v25_v23 = vld [vmem:[%s5080_s1 + $0x48] sm:$0xff]  ;;  %3341 = vmatpush3.bf16.msra.mxu1 %v3340_v18  ;;  %v3343_v24 = vpack.c.bf16 %v1935_v20, %v1934_v19 }
   0xb   :  { %3342 = vmatprep.subr.bf16.mxu1 %v3820_v3  ;;  %v1936_v25 = vld [vmem:[%s5080_s1 + $0xb0] sm:$0xff]  ;;  %v1937_v26 = vld [vmem:[%s5080_s1 + $0xb8] sm:$0xff]  ;;  %v3325_v27 = vpack.c.bf16 %v25_v23, %v24_v22  ;;  %v1938_v31 = vld [vmem:[%s5080_s1 + $0xc0] sm:$0xff] }
   0xc   :  { %3320 = vmatpush3.bf16.msra.mxu0 %v3319_v14  ;;  %v26_v28 = vld [vmem:[%s5080_s1 + $0x50] sm:$0xff]  ;;  %v27_v29 = vld [vmem:[%s5080_s1 + $0x58] sm:$0xff]  ;;  %v3346_v30 = vpack.c.bf16 %v1937_v26, %v1936_v25  ;;  %v1939_v32 = vld [vmem:[%s5080_s1 + $0xc8] sm:$0xff] }
   0xd   :  { %3321 = vmatprep.subr.bf16.mxu0 %v3820_v3  ;;  %v3328_v33 = vpack.c.bf16 %v27_v29, %v26_v28  ;;  %v28_v34 = vld [vmem:[%s5080_s1 + $0x60] sm:$0xff]  ;;  %v29_v35 = vld [vmem:[%s5080_s1 + $0x68] sm:$0xff]  ;;  %v3349_v36 = vpack.c.bf16 %v1939_v32, %v1938_v31  ;;  %v1940_v37 = vld [vmem:[%s5080_s1 + $0xd0] sm:$0xff] }
   0xe   :  { %3344 = vmatpush3.bf16.msra.mxu1 %v3343_v24  ;;  %v1941_v38 = vld [vmem:[%s5080_s1 + $0xd8] sm:$0xff]  ;;  %v3331_v39 = vpack.c.bf16 %v29_v35, %v28_v34  ;;  %v30_v40 = vld [vmem:[%s5080_s1 + $0x70] sm:$0xff]  ;;  %v1942_v43 = vld [vmem:[%s5080_s1 + $0xe0] sm:$0xff] }
   0xf   :  { %3345 = vmatprep.subr.bf16.mxu1 %v3820_v3  ;;  %v31_v41 = vld [vmem:[%s5080_s1 + $0x78] sm:$0xff]  ;;  %v3352_v42 = vpack.c.bf16 %v1941_v38, %v1940_v37  ;;  %v1943_v44 = vld [vmem:[%s5080_s1 + $0xe8] sm:$0xff]  ;;  %v15_v47 = vld [vmem:[%s5079_s0] sm:$0xff]  ;;  %s3823_s0 = smov [#allocation2]  }
  0x10   :  { %3323 = vmatpush3.bf16.msra.mxu0 %v3322_v21  ;;  %v3334_v45 = vpack.c.bf16 %v31_v41, %v30_v40  ;;  %v3355_v46 = vpack.c.bf16 %v1943_v44, %v1942_v43  ;;  %v1944_v48 = vld [vmem:[%s5080_s1 + $0xf0] sm:$0xff]  ;;  %v1945_v49 = vld [vmem:[%s5080_s1 + $0xf8] sm:$0xff]  ;;  %v1948_v51 = vld [vmem:[%s5080_s1 + $0x100] sm:$0xff]  ;;  %s1921_s24 = sshll.u32 %s3823_s0, 4  ;;  %s1922_s24 = int_to_ptr.vmem [resolvable:$true] %s1921_s24 }
  0x11   :  { %3324 = vmatprep.subr.bf16.mxu0 %v3820_v3  ;;  %v3358_v50 = vpack.c.bf16 %v1945_v49, %v1944_v48  ;;  %v1949_v52 = vld [vmem:[%s5080_s1 + $0x108] sm:$0xff]  ;;  %v1950_v53 = vld [vmem:[%s5080_s1 + $0x110] sm:$0xff]  ;;  %v1951_v55 = vld [vmem:[%s5080_s1 + $0x118] sm:$0xff]  ;;  %p3801_p1 = scmp.lt.s32.totalorder %s1922_s24, %s1922_s24 }
  0x12   :  { %3347 = vmatpush3.bf16.msra.mxu1 %v3346_v30  ;;  %v3361_v54 = vpack.c.bf16 %v1949_v52, %v1948_v51  ;;  %v3364_v56 = vpack.c.bf16 %v1951_v55, %v1950_v53  ;;  %v1952_v57 = vld [vmem:[%s5080_s1 + $0x120] sm:$0xff]  ;;  %v1953_v58 = vld [vmem:[%s5080_s1 + $0x128] sm:$0xff]  ;;  %v1954_v60 = vld [vmem:[%s5080_s1 + $0x130] sm:$0xff] }
  0x13   :  { %3348 = vmatprep.subr.bf16.mxu1 %v3820_v3  ;;  %v3367_v59 = vpack.c.bf16 %v1953_v58, %v1952_v57  ;;  %v1955_v61 = vld [vmem:[%s5080_s1 + $0x138] sm:$0xff]  ;;  %v1956_v63 = vld [vmem:[%s5080_s1 + $0x140] sm:$0xff]  ;;  %v1957_v0 = vld [vmem:[%s5080_s1 + $0x148] sm:$0xff] }
  0x14   :  { %3326 = vmatpush3.bf16.msra.mxu0 %v3325_v27  ;;  %v3370_v62 = vpack.c.bf16 %v1955_v61, %v1954_v60  ;;  %v3373_v1 = vpack.c.bf16 %v1957_v0, %v1956_v63  ;;  %v1958_v2 = vld [vmem:[%s5080_s1 + $0x150] sm:$0xff]  ;;  %v1959_v4 = vld [vmem:[%s5080_s1 + $0x158] sm:$0xff]  ;;  %v1960_v7 = vld [vmem:[%s5080_s1 + $0x160] sm:$0xff] }
  0x15   :  { %3327 = vmatprep.subr.bf16.mxu0 %v3820_v3  ;;  %v3376_v5 = vpack.c.bf16 %v1959_v4, %v1958_v2  ;;  %v1961_v8 = vld [vmem:[%s5080_s1 + $0x168] sm:$0xff]  ;;  %v1929_v10 = vld [vmem:[%s5081_s2] ss:$0 sm:$0xff]  ;;  %v1962_v14 = vld [vmem:[%s5080_s1 + $0x170] sm:$0xff] }
  0x16   :  { %3350 = vmatpush3.bf16.msra.mxu1 %v3349_v36  ;;  %v3379_v9 = vpack.c.bf16 %v1961_v8, %v1960_v7  ;;  %v1963_v15 = vld [vmem:[%s5080_s1 + $0x178] sm:$0xff]  ;;  %v1966_v17 = vld [vmem:[%s5080_s1 + $0x180] sm:$0xff]  ;;  %v1967_v18 = vld [vmem:[%s5080_s1 + $0x188] sm:$0xff] }
  0x17   :  { %3351 = vmatprep.subr.bf16.mxu1 %v3820_v3  ;;  %v3382_v16 = vpack.c.bf16 %v1963_v15, %v1962_v14  ;;  %v1968_v19 = vld [vmem:[%s5080_s1 + $0x190] sm:$0xff]  ;;  %v3385_v20 = vpack.c.bf16 %v1967_v18, %v1966_v17  ;;  %v1969_v21 = vld [vmem:[%s5080_s1 + $0x198] sm:$0xff]  ;;  %v1970_v23 = vld [vmem:[%s5080_s1 + $0x1a0] sm:$0xff] }
  0x18   :  { %3329 = vmatpush3.bf16.msra.mxu0 %v3328_v33  ;;  %v3388_v22 = vpack.c.bf16 %v1969_v21, %v1968_v19  ;;  %v1971_v24 = vld [vmem:[%s5080_s1 + $0x1a8] sm:$0xff]  ;;  %v1972_v26 = vld [vmem:[%s5080_s1 + $0x1b0] sm:$0xff]  ;;  %v1973_v27 = vld [vmem:[%s5080_s1 + $0x1b8] sm:$0xff] }
  0x19   :  { %3330 = vmatprep.subr.bf16.mxu0 %v3820_v3  ;;  %v3391_v25 = vpack.c.bf16 %v1971_v24, %v1970_v23  ;;  %v3394_v28 = vpack.c.bf16 %v1973_v27, %v1972_v26  ;;  %v1974_v29 = vld [vmem:[%s5080_s1 + $0x1c0] sm:$0xff]  ;;  %v1975_v30 = vld [vmem:[%s5080_s1 + $0x1c8] sm:$0xff]  ;;  %v1976_v32 = vld [vmem:[%s5080_s1 + $0x1d0] sm:$0xff] }
  0x1a   :  { %3353 = vmatpush3.bf16.msra.mxu1 %v3352_v42  ;;  %v3397_v31 = vpack.c.bf16 %v1975_v30, %v1974_v29  ;;  %v1977_v33 = vld [vmem:[%s5080_s1 + $0x1d8] sm:$0xff]  ;;  %v1978_v35 = vld [vmem:[%s5080_s1 + $0x1e0] sm:$0xff]  ;;  %v1979_v36 = vld [vmem:[%s5080_s1 + $0x1e8] sm:$0xff] }
  0x1b   :  { %3354 = vmatprep.subr.bf16.mxu1 %v3820_v3  ;;  %v3400_v34 = vpack.c.bf16 %v1977_v33, %v1976_v32  ;;  %v3403_v37 = vpack.c.bf16 %v1979_v36, %v1978_v35  ;;  %v1947_v38 = vld [vmem:[%s5081_s2 + $0x1] ss:$0 sm:$0xff]  ;;  %v1980_v42 = vld [vmem:[%s5080_s1 + $0x1f0] sm:$0xff]  ;;  %v1981_v43 = vld [vmem:[%s5080_s1 + $0x1f8] sm:$0xff] }
  0x1c   :  { %3332 = vmatpush3.bf16.msra.mxu0 %v3331_v39  ;;  %v3406_v44 = vpack.c.bf16 %v1981_v43, %v1980_v42  ;;  %v1987_v49 = vld [vmem:[%s5080_s1 + $0x218] sm:$0xff]  ;;  %v1988_v51 = vld [vmem:[%s5080_s1 + $0x220] sm:$0xff]  ;;  %v1989_v52 = vld [vmem:[%s5080_s1 + $0x228] sm:$0xff] }
  0x1d   :  { %3333 = vmatprep.subr.bf16.mxu0 %v3820_v3  ;;  %v3415_v53 = vpack.c.bf16 %v1989_v52, %v1988_v51  ;;  %v1991_v55 = vld [vmem:[%s5080_s1 + $0x238] sm:$0xff]  ;;  %v1992_v57 = vld [vmem:[%s5080_s1 + $0x240] sm:$0xff]  ;;  %v1993_v58 = vld [vmem:[%s5080_s1 + $0x248] sm:$0xff] }
  0x1e   :  { %3356 = vmatpush3.bf16.msra.mxu1 %v3355_v46  ;;  %v1985_v46 = vld [vmem:[%s5080_s1 + $0x208] sm:$0xff]  ;;  %v1994_v60 = vld [vmem:[%s5080_s1 + $0x250] sm:$0xff]  ;;  %v1995_v61 = vld [vmem:[%s5080_s1 + $0x258] sm:$0xff] }
  0x1f   :  { %3357 = vmatprep.subr.bf16.mxu1 %v3820_v3  ;;  %v1996_v63 = vld [vmem:[%s5080_s1 + $0x260] sm:$0xff]  ;;  %v1997_v0 = vld [vmem:[%s5080_s1 + $0x268] sm:$0xff]  ;;  %v1998_v8 = vld [vmem:[%s5080_s1 + $0x270] sm:$0xff] }
  0x20   :  { %3335 = vmatpush3.bf16.msra.mxu0 %v3334_v45  ;;  %v1984_v45 = vld [vmem:[%s5080_s1 + $0x200] sm:$0xff]  ;;  %v2005_v15 = vld [vmem:[%s5080_s1 + $0x298] sm:$0xff]  ;;  %v2007_v18 = vld [vmem:[%s5080_s1 + $0x2a8] sm:$0xff] }
  0x21   :  { %3360 = vmatprep.subr.bf16.mxu0 %v3820_v3  ;;  %v3409_v48 = vpack.c.bf16 %v1985_v46, %v1984_v45  ;;  %v1965_v2 = vld [vmem:[%s5081_s2 + $0x2] ss:$0 sm:$0xff]  ;;  %v2009_v21 = vld [vmem:[%s5080_s1 + $0x2b8] sm:$0xff]  ;;  %v2011_v24 = vld [vmem:[%s5080_s1 + $0x2c8] sm:$0xff] }
  0x22   :  { %3359 = vmatpush3.bf16.msra.mxu1 %v3358_v50  ;;  %v2006_v17 = vld [vmem:[%s5080_s1 + $0x2a0] sm:$0xff]  ;;  %v2012_v26 = vld [vmem:[%s5080_s1 + $0x2d0] sm:$0xff]  ;;  %v2013_v27 = vld [vmem:[%s5080_s1 + $0x2d8] sm:$0xff] }
  0x23   :  { %2645 = vmatmul.mubr.f32.vlgmr.msra.gmra.mrb[0].mxu0 %v15_v47  ;;  %3384 = vmatprep.subr.bf16.mxu1 %v3820_v3  ;;  %v1986_v47 = vld [vmem:[%s5080_s1 + $0x210] sm:$0xff]  ;;  %v3439_v19 = vpack.c.bf16 %v2007_v18, %v2006_v17  ;;  %v2010_v23 = vld [vmem:[%s5080_s1 + $0x2c0] sm:$0xff]  ;;  %v2015_v30 = vld [vmem:[%s5080_s1 + $0x2e8] sm:$0xff] }
  0x24   :  { %2714 = vmatprep.mubr.msk.f32.mxu0 %vm3821_vm0, %v3822_v6  ;;  %3362 = vmatpush3.bf16.msra.mxu0 %v3361_v54  ;;  %v3412_v50 = vpack.c.bf16 %v1987_v49, %v1986_v47  ;;  %v1990_v54 = vld [vmem:[%s5080_s1 + $0x230] sm:$0xff]  ;;  %v2014_v29 = vld [vmem:[%s5080_s1 + $0x2e0] sm:$0xff]  ;;  %v2023_v43 = vld [vmem:[%s5080_s1 + $0x318] sm:$0xff] }
  0x25   :  { %3363 = vmatprep.subr.bf16.mxu0 %v3820_v3  ;;  %v1983_v32 = vld [vmem:[%s5081_s2 + $0x3] ss:$0 sm:$0xff]  ;;  %v2016_v36 = vld [vmem:[%s5080_s1 + $0x2f0] sm:$0xff]  ;;  %v2025_v46 = vld [vmem:[%s5080_s1 + $0x328] sm:$0xff] }
  0x26   :  { %v2024_v45 = vld [vmem:[%s5080_s1 + $0x320] sm:$0xff]  ;;  %v2027_v49 = vld [vmem:[%s5080_s1 + $0x338] sm:$0xff]  ;;  %v2029_v52 = vld [vmem:[%s5080_s1 + $0x348] sm:$0xff] }
  0x27   :  { %v3463_v47 = vpack.c.bf16 %v2025_v46, %v2024_v45  ;;  %v2028_v51 = vld [vmem:[%s5080_s1 + $0x340] sm:$0xff]  ;;  %v2047_v18 = vld [vmem:[%s5080_s1 + $0x3c8] sm:$0xff] }
  0x28   :  { %3365 = vmatpush3.bf16.msra.mxu0 %v3364_v56  ;;  %v3418_v56 = vpack.c.bf16 %v1991_v55, %v1990_v54  ;;  %v2030_v54 = vld [vmem:[%s5080_s1 + $0x350] sm:$0xff]  ;;  %v2031_v55 = vld [vmem:[%s5080_s1 + $0x358] sm:$0xff]  ;;  %v2046_v17 = vld [vmem:[%s5080_s1 + $0x3c0] sm:$0xff] }
  0x29   :  { %3366 = vmatprep.subr.bf16.mxu0 %v3820_v3  ;;  %v2064_v45 = vld [vmem:[%s5080_s1 + $0x440] sm:$0xff]  ;;  %v2065_v46 = vld [vmem:[%s5080_s1 + $0x448] sm:$0xff] }
  0x2c   :  { %3368 = vmatpush3.bf16.msra.mxu0 %v3367_v59  ;;  %v3421_v59 = vpack.c.bf16 %v1993_v58, %v1992_v57  ;;  %v2032_v57 = vld [vmem:[%s5080_s1 + $0x360] sm:$0xff]  ;;  %v2033_v58 = vld [vmem:[%s5080_s1 + $0x368] sm:$0xff] }
  0x2d   :  { %3369 = vmatprep.subr.bf16.mxu0 %v3820_v3 }
  0x30   :  { %3371 = vmatpush3.bf16.msra.mxu0 %v3370_v62  ;;  %v3424_v62 = vpack.c.bf16 %v1995_v61, %v1994_v60  ;;  %v2001_v60 = vld [vmem:[%s5081_s2 + $0x4] ss:$0 sm:$0xff] }
  0x31   :  { %3372 = vmatprep.subr.bf16.mxu0 %v3820_v3 }
  0x34   :  { %3374 = vmatpush3.bf16.msra.mxu0 %v3373_v1  ;;  %v3427_v1 = vpack.c.bf16 %v1997_v0, %v1996_v63  ;;  %v2034_v0 = vld [vmem:[%s5080_s1 + $0x370] sm:$0xff] }
  0x35   :  { %3375 = vmatprep.subr.bf16.mxu0 %v3820_v3 }
  0x38   :  { %3377 = vmatpush3.bf16.msra.mxu0 %v3376_v5 }
  0x39   :  { %3378 = vmatprep.subr.bf16.mxu0 %v3820_v3 }
  0x3c   :  { %3380 = vmatpush3.bf16.msra.mxu0 %v3379_v9  ;;  %v1999_v9 = vld [vmem:[%s5080_s1 + $0x278] sm:$0xff] }
  0x3d   :  { %3381 = vmatprep.subr.bf16.mxu0 %v3820_v3 }
  0x40   :  { %3383 = vmatpush3.bf16.msra.mxu0 %v3382_v16 }
  0x41   :  { %3408 = vmatprep.subr.bf16.mxu0 %v3820_v3 }
  0xf6   :  { %v105_v11 = vpop.f32.mrb[0].mxu0 }
  0xf7   :  { %v106_v12 = vadd.f32 %v1929_v10, %v105_v11  ;;  %v2646_v13 = vpop.f32.mrb[1].mxu0  ;;  %v3430_v10 = vpack.c.bf16 %v1999_v9, %v1998_v8  ;;  %v2002_v11 = vld [vmem:[%s5080_s1 + $0x280] sm:$0xff]  ;;  %v2041_v9 = vld [vmem:[%s5080_s1 + $0x398] sm:$0xff] }
  0xf8   :  { %v2004_v13 = vld [vmem:[%s5080_s1 + $0x290] sm:$0xff] }
  0xf9   :  { %2680 = vmatmul.mubr.f32.vlgmr.msra.gmra.mrb[0].mxu1 %v106_v12  ;;  %v2003_v12 = vld [vmem:[%s5080_s1 + $0x288] sm:$0xff]  ;;  %v3436_v16 = vpack.c.bf16 %v2005_v15, %v2004_v13  ;;  %v2045_v15 = vld [vmem:[%s5080_s1 + $0x3b8] sm:$0xff] }
  0xfa   :  { %2749 = vmatprep.mubr.msk.f32.mxu1 %vm3821_vm0, %v3822_v6  ;;  %3386 = vmatpush3.bf16.msra.mxu1 %v3385_v20  ;;  %v3433_v14 = vpack.c.bf16 %v2003_v12, %v2002_v11  ;;  %v2008_v20 = vld [vmem:[%s5080_s1 + $0x2b0] sm:$0xff]  ;;  %v2042_v11 = vld [vmem:[%s5080_s1 + $0x3a0] sm:$0xff]  ;;  %v2043_v12 = vld [vmem:[%s5080_s1 + $0x3a8] sm:$0xff] }
  0xfb   :  { %3387 = vmatprep.subr.bf16.mxu1 %v3820_v3  ;;  %v3487_v13 = vpack.c.bf16 %v2043_v12, %v2042_v11  ;;  %v2082_v11 = vld [vmem:[%s5080_s1 + $0x4c0] sm:$0xff]  ;;  %v2083_v12 = vld [vmem:[%s5080_s1 + $0x4c8] sm:$0xff] }
  0xfe   :  { %3389 = vmatpush3.bf16.msra.mxu1 %v3388_v22  ;;  %v3442_v22 = vpack.c.bf16 %v2009_v21, %v2008_v20  ;;  %v2048_v20 = vld [vmem:[%s5080_s1 + $0x3d0] sm:$0xff]  ;;  %v2049_v21 = vld [vmem:[%s5080_s1 + $0x3d8] sm:$0xff] }
  0xff   :  { %3390 = vmatprep.subr.bf16.mxu1 %v3820_v3 }
 0x102   :  { %3392 = vmatpush3.bf16.msra.mxu1 %v3391_v25  ;;  %v3445_v25 = vpack.c.bf16 %v2011_v24, %v2010_v23  ;;  %v2050_v23 = vld [vmem:[%s5080_s1 + $0x3e0] sm:$0xff]  ;;  %v2051_v24 = vld [vmem:[%s5080_s1 + $0x3e8] sm:$0xff] }
 0x103   :  { %3393 = vmatprep.subr.bf16.mxu1 %v3820_v3 }
 0x106   :  { %3395 = vmatpush3.bf16.msra.mxu1 %v3394_v28  ;;  %v3448_v28 = vpack.c.bf16 %v2013_v27, %v2012_v26  ;;  %v2019_v26 = vld [vmem:[%s5081_s2 + $0x5] ss:$0 sm:$0xff] }
 0x107   :  { %3396 = vmatprep.subr.bf16.mxu1 %v3820_v3 }
 0x10a   :  { %3398 = vmatpush3.bf16.msra.mxu1 %v3397_v31  ;;  %v3451_v31 = vpack.c.bf16 %v2015_v30, %v2014_v29  ;;  %v2052_v30 = vld [vmem:[%s5080_s1 + $0x3f0] sm:$0xff] }
 0x10b   :  { %3399 = vmatprep.subr.bf16.mxu1 %v3820_v3 }
 0x10e   :  { %3401 = vmatpush3.bf16.msra.mxu1 %v3400_v34 }
 0x10f   :  { %3402 = vmatprep.subr.bf16.mxu1 %v3820_v3 }
 0x112   :  { %3404 = vmatpush3.bf16.msra.mxu1 %v3403_v37  ;;  %v2017_v37 = vld [vmem:[%s5080_s1 + $0x2f8] sm:$0xff] }
 0x113   :  { %3405 = vmatprep.subr.bf16.mxu1 %v3820_v3 }
 0x116   :  { %3407 = vmatpush3.bf16.msra.mxu1 %v3406_v44 }
 0x117   :  { %3432 = vmatprep.subr.bf16.mxu1 %v3820_v3 }
 0x1cc   :  { %v200_v39 = vpop.f32.mrb[0].mxu1 }
 0x1cd   :  { %v201_v40 = vadd.f32 %v1947_v38, %v200_v39  ;;  %v2681_v41 = vpop.f32.mrb[1].mxu1  ;;  %v3454_v38 = vpack.c.bf16 %v2017_v37, %v2016_v36  ;;  %v2020_v39 = vld [vmem:[%s5080_s1 + $0x300] sm:$0xff]  ;;  %v2059_v37 = vld [vmem:[%s5080_s1 + $0x418] sm:$0xff] }
 0x1ce   :  { %v2022_v41 = vld [vmem:[%s5080_s1 + $0x310] sm:$0xff] }
 0x1cf   :  { %2715 = vmatmul.mubr.f32.vlgmr.msra.gmra.mrb[2].mxu0 %v201_v40  ;;  %v2021_v40 = vld [vmem:[%s5080_s1 + $0x308] sm:$0xff]  ;;  %v3460_v44 = vpack.c.bf16 %v2023_v43, %v2022_v41  ;;  %v2063_v43 = vld [vmem:[%s5080_s1 + $0x438] sm:$0xff] }
 0x1d0   :  { %2784 = vmatprep.mubr.msk.f32.mxu0 %vm3821_vm0, %v3822_v6  ;;  %3410 = vmatpush3.bf16.msra.mxu0 %v3409_v48  ;;  %v3457_v42 = vpack.c.bf16 %v2021_v40, %v2020_v39  ;;  %v2026_v48 = vld [vmem:[%s5080_s1 + $0x330] sm:$0xff]  ;;  %v2060_v39 = vld [vmem:[%s5080_s1 + $0x420] sm:$0xff]  ;;  %v2061_v40 = vld [vmem:[%s5080_s1 + $0x428] sm:$0xff] }
 0x1d1   :  { %3411 = vmatprep.subr.bf16.mxu0 %v3820_v3  ;;  %v3511_v41 = vpack.c.bf16 %v2061_v40, %v2060_v39  ;;  %v2100_v39 = vld [vmem:[%s5080_s1 + $0x540] sm:$0xff]  ;;  %v2101_v40 = vld [vmem:[%s5080_s1 + $0x548] sm:$0xff] }
 0x1d4   :  { %3413 = vmatpush3.bf16.msra.mxu0 %v3412_v50  ;;  %v3466_v50 = vpack.c.bf16 %v2027_v49, %v2026_v48  ;;  %v2066_v48 = vld [vmem:[%s5080_s1 + $0x450] sm:$0xff]  ;;  %v2067_v49 = vld [vmem:[%s5080_s1 + $0x458] sm:$0xff] }
 0x1d5   :  { %3414 = vmatprep.subr.bf16.mxu0 %v3820_v3 }
 0x1d8   :  { %3416 = vmatpush3.bf16.msra.mxu0 %v3415_v53  ;;  %v3469_v53 = vpack.c.bf16 %v2029_v52, %v2028_v51  ;;  %v2068_v51 = vld [vmem:[%s5080_s1 + $0x460] sm:$0xff]  ;;  %v2069_v52 = vld [vmem:[%s5080_s1 + $0x468] sm:$0xff] }
 0x1d9   :  { %3417 = vmatprep.subr.bf16.mxu0 %v3820_v3 }
 0x1dc   :  { %3419 = vmatpush3.bf16.msra.mxu0 %v3418_v56  ;;  %v3472_v56 = vpack.c.bf16 %v2031_v55, %v2030_v54  ;;  %v2037_v54 = vld [vmem:[%s5081_s2 + $0x6] ss:$0 sm:$0xff] }
 0x1dd   :  { %3420 = vmatprep.subr.bf16.mxu0 %v3820_v3 }
 0x1e0   :  { %3422 = vmatpush3.bf16.msra.mxu0 %v3421_v59  ;;  %v3475_v59 = vpack.c.bf16 %v2033_v58, %v2032_v57  ;;  %v2070_v58 = vld [vmem:[%s5080_s1 + $0x470] sm:$0xff] }
 0x1e1   :  { %3423 = vmatprep.subr.bf16.mxu0 %v3820_v3 }
 0x1e4   :  { %3425 = vmatpush3.bf16.msra.mxu0 %v3424_v62 }
 0x1e5   :  { %3426 = vmatprep.subr.bf16.mxu0 %v3820_v3 }
 0x1e8   :  { %3428 = vmatpush3.bf16.msra.mxu0 %v3427_v1  ;;  %v2035_v1 = vld [vmem:[%s5080_s1 + $0x378] sm:$0xff] }
 0x1e9   :  { %3429 = vmatprep.subr.bf16.mxu0 %v3820_v3 }
 0x1ec   :  { %3431 = vmatpush3.bf16.msra.mxu0 %v3430_v10 }
 0x1ed   :  { %3456 = vmatprep.subr.bf16.mxu0 %v3820_v3 }
 0x2a2   :  { %v295_v4 = vpop.f32.mrb[2].mxu0 }
 0x2a3   :  { %v296_v5 = vadd.f32 %v1965_v2, %v295_v4  ;;  %v2716_v7 = vpop.f32.mrb[3].mxu0  ;;  %v3478_v2 = vpack.c.bf16 %v2035_v1, %v2034_v0  ;;  %v2038_v4 = vld [vmem:[%s5080_s1 + $0x380] sm:$0xff]  ;;  %v2077_v1 = vld [vmem:[%s5080_s1 + $0x498] sm:$0xff] }
 0x2a4   :  { %v2040_v7 = vld [vmem:[%s5080_s1 + $0x390] sm:$0xff] }
 0x2a5   :  { %2750 = vmatmul.mubr.f32.vlgmr.msra.gmra.mrb[2].mxu1 %v296_v5  ;;  %v2039_v5 = vld [vmem:[%s5080_s1 + $0x388] sm:$0xff]  ;;  %v3484_v10 = vpack.c.bf16 %v2041_v9, %v2040_v7  ;;  %v2081_v9 = vld [vmem:[%s5080_s1 + $0x4b8] sm:$0xff] }
 0x2a6   :  { %2819 = vmatprep.mubr.msk.f32.mxu1 %vm3821_vm0, %v3822_v6  ;;  %3434 = vmatpush3.bf16.msra.mxu1 %v3433_v14  ;;  %v3481_v8 = vpack.c.bf16 %v2039_v5, %v2038_v4  ;;  %v2044_v14 = vld [vmem:[%s5080_s1 + $0x3b0] sm:$0xff]  ;;  %v2078_v4 = vld [vmem:[%s5080_s1 + $0x4a0] sm:$0xff]  ;;  %v2079_v5 = vld [vmem:[%s5080_s1 + $0x4a8] sm:$0xff] }
 0x2a7   :  { %3435 = vmatprep.subr.bf16.mxu1 %v3820_v3  ;;  %v3535_v7 = vpack.c.bf16 %v2079_v5, %v2078_v4  ;;  %v2118_v4 = vld [vmem:[%s5080_s1 + $0x5c0] sm:$0xff]  ;;  %v2119_v5 = vld [vmem:[%s5080_s1 + $0x5c8] sm:$0xff] }
 0x2aa   :  { %3437 = vmatpush3.bf16.msra.mxu1 %v3436_v16  ;;  %v3490_v16 = vpack.c.bf16 %v2045_v15, %v2044_v14  ;;  %v2084_v14 = vld [vmem:[%s5080_s1 + $0x4d0] sm:$0xff]  ;;  %v2085_v15 = vld [vmem:[%s5080_s1 + $0x4d8] sm:$0xff] }
 0x2ab   :  { %3438 = vmatprep.subr.bf16.mxu1 %v3820_v3 }
 0x2ae   :  { %3440 = vmatpush3.bf16.msra.mxu1 %v3439_v19  ;;  %v3493_v19 = vpack.c.bf16 %v2047_v18, %v2046_v17  ;;  %v2086_v17 = vld [vmem:[%s5080_s1 + $0x4e0] sm:$0xff]  ;;  %v2087_v18 = vld [vmem:[%s5080_s1 + $0x4e8] sm:$0xff] }
 0x2af   :  { %3441 = vmatprep.subr.bf16.mxu1 %v3820_v3 }
 0x2b2   :  { %3443 = vmatpush3.bf16.msra.mxu1 %v3442_v22  ;;  %v3496_v22 = vpack.c.bf16 %v2049_v21, %v2048_v20  ;;  %v2055_v20 = vld [vmem:[%s5081_s2 + $0x7] ss:$0 sm:$0xff] }
 0x2b3   :  { %3444 = vmatprep.subr.bf16.mxu1 %v3820_v3 }
 0x2b6   :  { %3446 = vmatpush3.bf16.msra.mxu1 %v3445_v25  ;;  %v3499_v25 = vpack.c.bf16 %v2051_v24, %v2050_v23  ;;  %v2088_v24 = vld [vmem:[%s5080_s1 + $0x4f0] sm:$0xff] }
 0x2b7   :  { %3447 = vmatprep.subr.bf16.mxu1 %v3820_v3 }
 0x2ba   :  { %3449 = vmatpush3.bf16.msra.mxu1 %v3448_v28 }
 0x2bb   :  { %3450 = vmatprep.subr.bf16.mxu1 %v3820_v3 }
 0x2be   :  { %3452 = vmatpush3.bf16.msra.mxu1 %v3451_v31  ;;  %v2053_v31 = vld [vmem:[%s5080_s1 + $0x3f8] sm:$0xff] }
 0x2bf   :  { %3453 = vmatprep.subr.bf16.mxu1 %v3820_v3 }
 0x2c2   :  { %3455 = vmatpush3.bf16.msra.mxu1 %v3454_v38 }
 0x2c3   :  { %3480 = vmatprep.subr.bf16.mxu1 %v3820_v3 }
 0x378   :  { %v390_v33 = vpop.f32.mrb[2].mxu1 }
 0x379   :  { %v391_v34 = vadd.f32 %v1983_v32, %v390_v33  ;;  %v2751_v35 = vpop.f32.mrb[3].mxu1  ;;  %v3502_v32 = vpack.c.bf16 %v2053_v31, %v2052_v30  ;;  %v2056_v33 = vld [vmem:[%s5080_s1 + $0x400] sm:$0xff]  ;;  %v2095_v31 = vld [vmem:[%s5080_s1 + $0x518] sm:$0xff] }
 0x37a   :  { %v2058_v35 = vld [vmem:[%s5080_s1 + $0x410] sm:$0xff] }
 0x37b   :  { %2785 = vmatmul.mubr.f32.vlgmr.msra.gmra.mrb[4].mxu0 %v391_v34  ;;  %v2057_v34 = vld [vmem:[%s5080_s1 + $0x408] sm:$0xff]  ;;  %v3508_v38 = vpack.c.bf16 %v2059_v37, %v2058_v35  ;;  %v2099_v37 = vld [vmem:[%s5080_s1 + $0x538] sm:$0xff] }
 0x37c   :  { %2854 = vmatprep.mubr.msk.f32.mxu0 %vm3821_vm0, %v3822_v6  ;;  %3458 = vmatpush3.bf16.msra.mxu0 %v3457_v42  ;;  %v3505_v36 = vpack.c.bf16 %v2057_v34, %v2056_v33  ;;  %v2062_v42 = vld [vmem:[%s5080_s1 + $0x430] sm:$0xff]  ;;  %v2096_v33 = vld [vmem:[%s5080_s1 + $0x520] sm:$0xff]  ;;  %v2097_v34 = vld [vmem:[%s5080_s1 + $0x528] sm:$0xff] }
 0x37d   :  { %3459 = vmatprep.subr.bf16.mxu0 %v3820_v3  ;;  %v3559_v35 = vpack.c.bf16 %v2097_v34, %v2096_v33  ;;  %v2136_v33 = vld [vmem:[%s5080_s1 + $0x640] sm:$0xff]  ;;  %v2137_v34 = vld [vmem:[%s5080_s1 + $0x648] sm:$0xff] }
 0x380   :  { %3461 = vmatpush3.bf16.msra.mxu0 %v3460_v44  ;;  %v3514_v44 = vpack.c.bf16 %v2063_v43, %v2062_v42  ;;  %v2102_v42 = vld [vmem:[%s5080_s1 + $0x550] sm:$0xff]  ;;  %v2103_v43 = vld [vmem:[%s5080_s1 + $0x558] sm:$0xff] }
 0x381   :  { %3462 = vmatprep.subr.bf16.mxu0 %v3820_v3 }
 0x384   :  { %3464 = vmatpush3.bf16.msra.mxu0 %v3463_v47  ;;  %v3517_v47 = vpack.c.bf16 %v2065_v46, %v2064_v45  ;;  %v2104_v45 = vld [vmem:[%s5080_s1 + $0x560] sm:$0xff]  ;;  %v2105_v46 = vld [vmem:[%s5080_s1 + $0x568] sm:$0xff] }
 0x385   :  { %3465 = vmatprep.subr.bf16.mxu0 %v3820_v3 }
 0x388   :  { %3467 = vmatpush3.bf16.msra.mxu0 %v3466_v50  ;;  %v3520_v50 = vpack.c.bf16 %v2067_v49, %v2066_v48  ;;  %v2073_v48 = vld [vmem:[%s5081_s2 + $0x8] ss:$0 sm:$0xff] }
 0x389   :  { %3468 = vmatprep.subr.bf16.mxu0 %v3820_v3 }
 0x38c   :  { %3470 = vmatpush3.bf16.msra.mxu0 %v3469_v53  ;;  %v3523_v53 = vpack.c.bf16 %v2069_v52, %v2068_v51  ;;  %v2106_v52 = vld [vmem:[%s5080_s1 + $0x570] sm:$0xff] }
 0x38d   :  { %3471 = vmatprep.subr.bf16.mxu0 %v3820_v3 }
 0x390   :  { %3473 = vmatpush3.bf16.msra.mxu0 %v3472_v56 }
 0x391   :  { %3474 = vmatprep.subr.bf16.mxu0 %v3820_v3 }
 0x394   :  { %3476 = vmatpush3.bf16.msra.mxu0 %v3475_v59  ;;  %v2071_v59 = vld [vmem:[%s5080_s1 + $0x478] sm:$0xff] }
 0x395   :  { %3477 = vmatprep.subr.bf16.mxu0 %v3820_v3 }
 0x398   :  { %3479 = vmatpush3.bf16.msra.mxu0 %v3478_v2 }
 0x399   :  { %3504 = vmatprep.subr.bf16.mxu0 %v3820_v3 }
 0x44e   :  { %v485_v61 = vpop.f32.mrb[4].mxu0 }
 0x44f   :  { %v486_v62 = vadd.f32 %v2001_v60, %v485_v61  ;;  %v2786_v63 = vpop.f32.mrb[5].mxu0  ;;  %v3526_v60 = vpack.c.bf16 %v2071_v59, %v2070_v58  ;;  %v2074_v61 = vld [vmem:[%s5080_s1 + $0x480] sm:$0xff]  ;;  %v2113_v59 = vld [vmem:[%s5080_s1 + $0x598] sm:$0xff] }
 0x450   :  { %v2076_v63 = vld [vmem:[%s5080_s1 + $0x490] sm:$0xff] }
 0x451   :  { %2820 = vmatmul.mubr.f32.vlgmr.msra.gmra.mrb[4].mxu1 %v486_v62  ;;  %v2075_v62 = vld [vmem:[%s5080_s1 + $0x488] sm:$0xff]  ;;  %v3532_v2 = vpack.c.bf16 %v2077_v1, %v2076_v63  ;;  %v2117_v1 = vld [vmem:[%s5080_s1 + $0x5b8] sm:$0xff] }
 0x452   :  { %2889 = vmatprep.mubr.msk.f32.mxu1 %vm3821_vm0, %v3822_v6  ;;  %3482 = vmatpush3.bf16.msra.mxu1 %v3481_v8  ;;  %v3529_v0 = vpack.c.bf16 %v2075_v62, %v2074_v61  ;;  %v2080_v8 = vld [vmem:[%s5080_s1 + $0x4b0] sm:$0xff]  ;;  %v2114_v61 = vld [vmem:[%s5080_s1 + $0x5a0] sm:$0xff]  ;;  %v2115_v62 = vld [vmem:[%s5080_s1 + $0x5a8] sm:$0xff] }
 0x453   :  { %3483 = vmatprep.subr.bf16.mxu1 %v3820_v3  ;;  %v3583_v63 = vpack.c.bf16 %v2115_v62, %v2114_v61  ;;  %v2154_v61 = vld [vmem:[%s5080_s1 + $0x6c0] sm:$0xff]  ;;  %v2155_v62 = vld [vmem:[%s5080_s1 + $0x6c8] sm:$0xff] }
 0x456   :  { %3485 = vmatpush3.bf16.msra.mxu1 %v3484_v10  ;;  %v3538_v10 = vpack.c.bf16 %v2081_v9, %v2080_v8  ;;  %v2120_v8 = vld [vmem:[%s5080_s1 + $0x5d0] sm:$0xff]  ;;  %v2121_v9 = vld [vmem:[%s5080_s1 + $0x5d8] sm:$0xff] }
 0x457   :  { %3486 = vmatprep.subr.bf16.mxu1 %v3820_v3 }
 0x45a   :  { %3488 = vmatpush3.bf16.msra.mxu1 %v3487_v13  ;;  %v3541_v13 = vpack.c.bf16 %v2083_v12, %v2082_v11  ;;  %v2122_v11 = vld [vmem:[%s5080_s1 + $0x5e0] sm:$0xff]  ;;  %v2123_v12 = vld [vmem:[%s5080_s1 + $0x5e8] sm:$0xff] }
 0x45b   :  { %3489 = vmatprep.subr.bf16.mxu1 %v3820_v3 }
 0x45e   :  { %3491 = vmatpush3.bf16.msra.mxu1 %v3490_v16  ;;  %v3544_v16 = vpack.c.bf16 %v2085_v15, %v2084_v14  ;;  %v2091_v14 = vld [vmem:[%s5081_s2 + $0x9] ss:$0 sm:$0xff] }
 0x45f   :  { %3492 = vmatprep.subr.bf16.mxu1 %v3820_v3 }
 0x462   :  { %3494 = vmatpush3.bf16.msra.mxu1 %v3493_v19  ;;  %v3547_v19 = vpack.c.bf16 %v2087_v18, %v2086_v17  ;;  %v2124_v18 = vld [vmem:[%s5080_s1 + $0x5f0] sm:$0xff] }
 0x463   :  { %3495 = vmatprep.subr.bf16.mxu1 %v3820_v3 }
 0x466   :  { %3497 = vmatpush3.bf16.msra.mxu1 %v3496_v22 }
 0x467   :  { %3498 = vmatprep.subr.bf16.mxu1 %v3820_v3 }
 0x46a   :  { %3500 = vmatpush3.bf16.msra.mxu1 %v3499_v25  ;;  %v2089_v25 = vld [vmem:[%s5080_s1 + $0x4f8] sm:$0xff] }
 0x46b   :  { %3501 = vmatprep.subr.bf16.mxu1 %v3820_v3 }
 0x46e   :  { %3503 = vmatpush3.bf16.msra.mxu1 %v3502_v32 }
 0x46f   :  { %3528 = vmatprep.subr.bf16.mxu1 %v3820_v3 }
 0x524   :  { %v580_v27 = vpop.f32.mrb[4].mxu1 }
 0x525   :  { %v581_v28 = vadd.f32 %v2019_v26, %v580_v27  ;;  %v2821_v29 = vpop.f32.mrb[5].mxu1  ;;  %v3550_v26 = vpack.c.bf16 %v2089_v25, %v2088_v24  ;;  %v2092_v27 = vld [vmem:[%s5080_s1 + $0x500] sm:$0xff]  ;;  %v2131_v25 = vld [vmem:[%s5080_s1 + $0x618] sm:$0xff] }
 0x526   :  { %v2094_v29 = vld [vmem:[%s5080_s1 + $0x510] sm:$0xff] }
 0x527   :  { %2855 = vmatmul.mubr.f32.vlgmr.msra.gmra.mrb[6].mxu0 %v581_v28  ;;  %v2093_v28 = vld [vmem:[%s5080_s1 + $0x508] sm:$0xff]  ;;  %v3556_v32 = vpack.c.bf16 %v2095_v31, %v2094_v29  ;;  %v2135_v31 = vld [vmem:[%s5080_s1 + $0x638] sm:$0xff] }
 0x528   :  { %2924 = vmatprep.mubr.msk.f32.mxu0 %vm3821_vm0, %v3822_v6  ;;  %3506 = vmatpush3.bf16.msra.mxu0 %v3505_v36  ;;  %v3553_v30 = vpack.c.bf16 %v2093_v28, %v2092_v27  ;;  %v2098_v36 = vld [vmem:[%s5080_s1 + $0x530] sm:$0xff]  ;;  %v2132_v27 = vld [vmem:[%s5080_s1 + $0x620] sm:$0xff]  ;;  %v2133_v28 = vld [vmem:[%s5080_s1 + $0x628] sm:$0xff] }
 0x529   :  { %3507 = vmatprep.subr.bf16.mxu0 %v3820_v3  ;;  %v3607_v29 = vpack.c.bf16 %v2133_v28, %v2132_v27  ;;  %v2172_v27 = vld [vmem:[%s5080_s1 + $0x740] sm:$0xff]  ;;  %v2173_v28 = vld [vmem:[%s5080_s1 + $0x748] sm:$0xff] }
 0x52c   :  { %3509 = vmatpush3.bf16.msra.mxu0 %v3508_v38  ;;  %v3562_v38 = vpack.c.bf16 %v2099_v37, %v2098_v36  ;;  %v2138_v36 = vld [vmem:[%s5080_s1 + $0x650] sm:$0xff]  ;;  %v2139_v37 = vld [vmem:[%s5080_s1 + $0x658] sm:$0xff] }
 0x52d   :  { %3510 = vmatprep.subr.bf16.mxu0 %v3820_v3 }
 0x530   :  { %3512 = vmatpush3.bf16.msra.mxu0 %v3511_v41  ;;  %v3565_v41 = vpack.c.bf16 %v2101_v40, %v2100_v39  ;;  %v2140_v39 = vld [vmem:[%s5080_s1 + $0x660] sm:$0xff]  ;;  %v2141_v40 = vld [vmem:[%s5080_s1 + $0x668] sm:$0xff] }
 0x531   :  { %3513 = vmatprep.subr.bf16.mxu0 %v3820_v3 }
 0x534   :  { %3515 = vmatpush3.bf16.msra.mxu0 %v3514_v44  ;;  %v3568_v44 = vpack.c.bf16 %v2103_v43, %v2102_v42  ;;  %v2109_v42 = vld [vmem:[%s5081_s2 + $0xa] ss:$0 sm:$0xff] }
 0x535   :  { %3516 = vmatprep.subr.bf16.mxu0 %v3820_v3 }
 0x538   :  { %3518 = vmatpush3.bf16.msra.mxu0 %v3517_v47  ;;  %v3571_v47 = vpack.c.bf16 %v2105_v46, %v2104_v45  ;;  %v2142_v46 = vld [vmem:[%s5080_s1 + $0x670] sm:$0xff] }
 0x539   :  { %3519 = vmatprep.subr.bf16.mxu0 %v3820_v3 }
 0x53c   :  { %3521 = vmatpush3.bf16.msra.mxu0 %v3520_v50 }
 0x53d   :  { %3522 = vmatprep.subr.bf16.mxu0 %v3820_v3 }
 0x540   :  { %3524 = vmatpush3.bf16.msra.mxu0 %v3523_v53  ;;  %v2107_v53 = vld [vmem:[%s5080_s1 + $0x578] sm:$0xff] }
 0x541   :  { %3525 = vmatprep.subr.bf16.mxu0 %v3820_v3 }
 0x544   :  { %3527 = vmatpush3.bf16.msra.mxu0 %v3526_v60 }
 0x545   :  { %3552 = vmatprep.subr.bf16.mxu0 %v3820_v3 }
 0x5fa   :  { %v675_v55 = vpop.f32.mrb[6].mxu0 }
 0x5fb   :  { %v676_v56 = vadd.f32 %v2037_v54, %v675_v55  ;;  %v2856_v57 = vpop.f32.mrb[7].mxu0  ;;  %v3574_v54 = vpack.c.bf16 %v2107_v53, %v2106_v52  ;;  %v2110_v55 = vld [vmem:[%s5080_s1 + $0x580] sm:$0xff]  ;;  %v2149_v53 = vld [vmem:[%s5080_s1 + $0x698] sm:$0xff] }
 0x5fc   :  { %v2112_v57 = vld [vmem:[%s5080_s1 + $0x590] sm:$0xff] }
 0x5fd   :  { %2890 = vmatmul.mubr.f32.vlgmr.msra.gmra.mrb[6].mxu1 %v676_v56  ;;  %v2111_v56 = vld [vmem:[%s5080_s1 + $0x588] sm:$0xff]  ;;  %v3580_v60 = vpack.c.bf16 %v2113_v59, %v2112_v57  ;;  %v2153_v59 = vld [vmem:[%s5080_s1 + $0x6b8] sm:$0xff] }
 0x5fe   :  { %2959 = vmatprep.mubr.msk.f32.mxu1 %vm3821_vm0, %v3822_v6  ;;  %3530 = vmatpush3.bf16.msra.mxu1 %v3529_v0  ;;  %v3577_v58 = vpack.c.bf16 %v2111_v56, %v2110_v55  ;;  %v2116_v0 = vld [vmem:[%s5080_s1 + $0x5b0] sm:$0xff]  ;;  %v2150_v55 = vld [vmem:[%s5080_s1 + $0x6a0] sm:$0xff]  ;;  %v2151_v56 = vld [vmem:[%s5080_s1 + $0x6a8] sm:$0xff] }
 0x5ff   :  { %3531 = vmatprep.subr.bf16.mxu1 %v3820_v3  ;;  %v3631_v57 = vpack.c.bf16 %v2151_v56, %v2150_v55  ;;  %v2190_v55 = vld [vmem:[%s5080_s1 + $0x7c0] sm:$0xff]  ;;  %v2191_v56 = vld [vmem:[%s5080_s1 + $0x7c8] sm:$0xff] }
 0x602   :  { %3533 = vmatpush3.bf16.msra.mxu1 %v3532_v2  ;;  %v3586_v2 = vpack.c.bf16 %v2117_v1, %v2116_v0  ;;  %v2156_v0 = vld [vmem:[%s5080_s1 + $0x6d0] sm:$0xff]  ;;  %v2157_v1 = vld [vmem:[%s5080_s1 + $0x6d8] sm:$0xff] }
 0x603   :  { %3534 = vmatprep.subr.bf16.mxu1 %v3820_v3 }
 0x606   :  { %3536 = vmatpush3.bf16.msra.mxu1 %v3535_v7  ;;  %v3589_v7 = vpack.c.bf16 %v2119_v5, %v2118_v4  ;;  %v2158_v4 = vld [vmem:[%s5080_s1 + $0x6e0] sm:$0xff]  ;;  %v2159_v5 = vld [vmem:[%s5080_s1 + $0x6e8] sm:$0xff] }
 0x607   :  { %3537 = vmatprep.subr.bf16.mxu1 %v3820_v3 }
 0x60a   :  { %3539 = vmatpush3.bf16.msra.mxu1 %v3538_v10  ;;  %v3592_v10 = vpack.c.bf16 %v2121_v9, %v2120_v8  ;;  %v2127_v8 = vld [vmem:[%s5081_s2 + $0xb] ss:$0 sm:$0xff] }
 0x60b   :  { %3540 = vmatprep.subr.bf16.mxu1 %v3820_v3 }
 0x60e   :  { %3542 = vmatpush3.bf16.msra.mxu1 %v3541_v13  ;;  %v3595_v13 = vpack.c.bf16 %v2123_v12, %v2122_v11  ;;  %v2160_v12 = vld [vmem:[%s5080_s1 + $0x6f0] sm:$0xff] }
 0x60f   :  { %3543 = vmatprep.subr.bf16.mxu1 %v3820_v3 }
 0x612   :  { %3545 = vmatpush3.bf16.msra.mxu1 %v3544_v16 }
 0x613   :  { %3546 = vmatprep.subr.bf16.mxu1 %v3820_v3 }
 0x616   :  { %3548 = vmatpush3.bf16.msra.mxu1 %v3547_v19  ;;  %v2125_v19 = vld [vmem:[%s5080_s1 + $0x5f8] sm:$0xff] }
 0x617   :  { %3549 = vmatprep.subr.bf16.mxu1 %v3820_v3 }
 0x61a   :  { %3551 = vmatpush3.bf16.msra.mxu1 %v3550_v26 }
 0x61b   :  { %3576 = vmatprep.subr.bf16.mxu1 %v3820_v3 }
 0x6d0   :  { %v770_v21 = vpop.f32.mrb[6].mxu1 }
 0x6d1   :  { %v771_v22 = vadd.f32 %v2055_v20, %v770_v21  ;;  %v2891_v23 = vpop.f32.mrb[7].mxu1  ;;  %v3598_v20 = vpack.c.bf16 %v2125_v19, %v2124_v18  ;;  %v2128_v21 = vld [vmem:[%s5080_s1 + $0x600] sm:$0xff]  ;;  %v2167_v19 = vld [vmem:[%s5080_s1 + $0x718] sm:$0xff] }
 0x6d2   :  { %v2130_v23 = vld [vmem:[%s5080_s1 + $0x610] sm:$0xff] }
 0x6d3   :  { %2925 = vmatmul.mubr.f32.vlgmr.msra.gmra.mrb[8].mxu0 %v771_v22  ;;  %v2129_v22 = vld [vmem:[%s5080_s1 + $0x608] sm:$0xff]  ;;  %v3604_v26 = vpack.c.bf16 %v2131_v25, %v2130_v23  ;;  %v2171_v25 = vld [vmem:[%s5080_s1 + $0x738] sm:$0xff] }
 0x6d4   :  { %2994 = vmatprep.mubr.msk.f32.mxu0 %vm3821_vm0, %v3822_v6  ;;  %3554 = vmatpush3.bf16.msra.mxu0 %v3553_v30  ;;  %v3601_v24 = vpack.c.bf16 %v2129_v22, %v2128_v21  ;;  %v2134_v30 = vld [vmem:[%s5080_s1 + $0x630] sm:$0xff]  ;;  %v2168_v21 = vld [vmem:[%s5080_s1 + $0x720] sm:$0xff]  ;;  %v2169_v22 = vld [vmem:[%s5080_s1 + $0x728] sm:$0xff] }
 0x6d5   :  { %3555 = vmatprep.subr.bf16.mxu0 %v3820_v3  ;;  %v3655_v23 = vpack.c.bf16 %v2169_v22, %v2168_v21  ;;  %v2208_v21 = vld [vmem:[%s5080_s1 + $0x840] sm:$0xff]  ;;  %v2209_v22 = vld [vmem:[%s5080_s1 + $0x848] sm:$0xff] }
 0x6d8   :  { %3557 = vmatpush3.bf16.msra.mxu0 %v3556_v32  ;;  %v3610_v32 = vpack.c.bf16 %v2135_v31, %v2134_v30  ;;  %v2174_v30 = vld [vmem:[%s5080_s1 + $0x750] sm:$0xff]  ;;  %v2175_v31 = vld [vmem:[%s5080_s1 + $0x758] sm:$0xff] }
 0x6d9   :  { %3558 = vmatprep.subr.bf16.mxu0 %v3820_v3 }
 0x6dc   :  { %3560 = vmatpush3.bf16.msra.mxu0 %v3559_v35  ;;  %v3613_v35 = vpack.c.bf16 %v2137_v34, %v2136_v33  ;;  %v2176_v33 = vld [vmem:[%s5080_s1 + $0x760] sm:$0xff]  ;;  %v2177_v34 = vld [vmem:[%s5080_s1 + $0x768] sm:$0xff] }
 0x6dd   :  { %3561 = vmatprep.subr.bf16.mxu0 %v3820_v3 }
 0x6e0   :  { %3563 = vmatpush3.bf16.msra.mxu0 %v3562_v38  ;;  %v3616_v38 = vpack.c.bf16 %v2139_v37, %v2138_v36  ;;  %v2145_v36 = vld [vmem:[%s5081_s2 + $0xc] ss:$0 sm:$0xff] }
 0x6e1   :  { %3564 = vmatprep.subr.bf16.mxu0 %v3820_v3 }
 0x6e4   :  { %3566 = vmatpush3.bf16.msra.mxu0 %v3565_v41  ;;  %v3619_v41 = vpack.c.bf16 %v2141_v40, %v2140_v39  ;;  %v2178_v40 = vld [vmem:[%s5080_s1 + $0x770] sm:$0xff] }
 0x6e5   :  { %3567 = vmatprep.subr.bf16.mxu0 %v3820_v3 }
 0x6e8   :  { %3569 = vmatpush3.bf16.msra.mxu0 %v3568_v44 }
 0x6e9   :  { %3570 = vmatprep.subr.bf16.mxu0 %v3820_v3 }
 0x6ec   :  { %3572 = vmatpush3.bf16.msra.mxu0 %v3571_v47  ;;  %v2143_v47 = vld [vmem:[%s5080_s1 + $0x678] sm:$0xff] }
 0x6ed   :  { %3573 = vmatprep.subr.bf16.mxu0 %v3820_v3 }
 0x6f0   :  { %3575 = vmatpush3.bf16.msra.mxu0 %v3574_v54 }
 0x6f1   :  { %3600 = vmatprep.subr.bf16.mxu0 %v3820_v3 }
 0x7a6   :  { %v865_v49 = vpop.f32.mrb[8].mxu0 }
 0x7a7   :  { %v866_v50 = vadd.f32 %v2073_v48, %v865_v49  ;;  %v2926_v51 = vpop.f32.mrb[9].mxu0  ;;  %v3622_v48 = vpack.c.bf16 %v2143_v47, %v2142_v46  ;;  %v2146_v49 = vld [vmem:[%s5080_s1 + $0x680] sm:$0xff]  ;;  %v2185_v47 = vld [vmem:[%s5080_s1 + $0x798] sm:$0xff] }
 0x7a8   :  { %v2148_v51 = vld [vmem:[%s5080_s1 + $0x690] sm:$0xff] }
 0x7a9   :  { %2960 = vmatmul.mubr.f32.vlgmr.msra.gmra.mrb[8].mxu1 %v866_v50  ;;  %v2147_v50 = vld [vmem:[%s5080_s1 + $0x688] sm:$0xff]  ;;  %v3628_v54 = vpack.c.bf16 %v2149_v53, %v2148_v51  ;;  %v2189_v53 = vld [vmem:[%s5080_s1 + $0x7b8] sm:$0xff] }
 0x7aa   :  { %3029 = vmatprep.mubr.msk.f32.mxu1 %vm3821_vm0, %v3822_v6  ;;  %3578 = vmatpush3.bf16.msra.mxu1 %v3577_v58  ;;  %v3625_v52 = vpack.c.bf16 %v2147_v50, %v2146_v49  ;;  %v2152_v58 = vld [vmem:[%s5080_s1 + $0x6b0] sm:$0xff]  ;;  %v2186_v49 = vld [vmem:[%s5080_s1 + $0x7a0] sm:$0xff]  ;;  %v2187_v50 = vld [vmem:[%s5080_s1 + $0x7a8] sm:$0xff] }
 0x7ab   :  { %3579 = vmatprep.subr.bf16.mxu1 %v3820_v3  ;;  %v3679_v51 = vpack.c.bf16 %v2187_v50, %v2186_v49  ;;  %v2226_v49 = vld [vmem:[%s5080_s1 + $0x8c0] sm:$0xff]  ;;  %v2227_v50 = vld [vmem:[%s5080_s1 + $0x8c8] sm:$0xff] }
 0x7ae   :  { %3581 = vmatpush3.bf16.msra.mxu1 %v3580_v60  ;;  %v3634_v60 = vpack.c.bf16 %v2153_v59, %v2152_v58  ;;  %v2192_v58 = vld [vmem:[%s5080_s1 + $0x7d0] sm:$0xff]  ;;  %v2193_v59 = vld [vmem:[%s5080_s1 + $0x7d8] sm:$0xff] }
 0x7af   :  { %3582 = vmatprep.subr.bf16.mxu1 %v3820_v3 }
 0x7b2   :  { %3584 = vmatpush3.bf16.msra.mxu1 %v3583_v63  ;;  %v3637_v63 = vpack.c.bf16 %v2155_v62, %v2154_v61  ;;  %v2194_v61 = vld [vmem:[%s5080_s1 + $0x7e0] sm:$0xff]  ;;  %v2195_v62 = vld [vmem:[%s5080_s1 + $0x7e8] sm:$0xff] }
 0x7b3   :  { %3585 = vmatprep.subr.bf16.mxu1 %v3820_v3 }
 0x7b6   :  { %3587 = vmatpush3.bf16.msra.mxu1 %v3586_v2  ;;  %v3640_v2 = vpack.c.bf16 %v2157_v1, %v2156_v0  ;;  %v2163_v0 = vld [vmem:[%s5081_s2 + $0xd] ss:$0 sm:$0xff] }
 0x7b7   :  { %3588 = vmatprep.subr.bf16.mxu1 %v3820_v3 }
 0x7ba   :  { %3590 = vmatpush3.bf16.msra.mxu1 %v3589_v7  ;;  %v3643_v7 = vpack.c.bf16 %v2159_v5, %v2158_v4  ;;  %v2196_v5 = vld [vmem:[%s5080_s1 + $0x7f0] sm:$0xff] }
 0x7bb   :  { %3591 = vmatprep.subr.bf16.mxu1 %v3820_v3 }
 0x7be   :  { %3593 = vmatpush3.bf16.msra.mxu1 %v3592_v10 }
 0x7bf   :  { %3594 = vmatprep.subr.bf16.mxu1 %v3820_v3 }
 0x7c2   :  { %3596 = vmatpush3.bf16.msra.mxu1 %v3595_v13  ;;  %v2161_v13 = vld [vmem:[%s5080_s1 + $0x6f8] sm:$0xff] }
 0x7c3   :  { %3597 = vmatprep.subr.bf16.mxu1 %v3820_v3 }
 0x7c6   :  { %3599 = vmatpush3.bf16.msra.mxu1 %v3598_v20 }
 0x7c7   :  { %3624 = vmatprep.subr.bf16.mxu1 %v3820_v3 }
 0x87c   :  { %v960_v15 = vpop.f32.mrb[8].mxu1 }
 0x87d   :  { %v961_v16 = vadd.f32 %v2091_v14, %v960_v15  ;;  %v2961_v17 = vpop.f32.mrb[9].mxu1  ;;  %v3646_v14 = vpack.c.bf16 %v2161_v13, %v2160_v12  ;;  %v2164_v15 = vld [vmem:[%s5080_s1 + $0x700] sm:$0xff]  ;;  %v2203_v13 = vld [vmem:[%s5080_s1 + $0x818] sm:$0xff] }
 0x87e   :  { %v2166_v17 = vld [vmem:[%s5080_s1 + $0x710] sm:$0xff] }
 0x87f   :  { %2995 = vmatmul.mubr.f32.vlgmr.msra.gmra.mrb[10].mxu0 %v961_v16  ;;  %v2165_v16 = vld [vmem:[%s5080_s1 + $0x708] sm:$0xff]  ;;  %v3652_v20 = vpack.c.bf16 %v2167_v19, %v2166_v17  ;;  %v2207_v19 = vld [vmem:[%s5080_s1 + $0x838] sm:$0xff] }
 0x880   :  { %3064 = vmatprep.mubr.msk.f32.mxu0 %vm3821_vm0, %v3822_v6  ;;  %3602 = vmatpush3.bf16.msra.mxu0 %v3601_v24  ;;  %v3649_v18 = vpack.c.bf16 %v2165_v16, %v2164_v15  ;;  %v2170_v24 = vld [vmem:[%s5080_s1 + $0x730] sm:$0xff]  ;;  %v2204_v15 = vld [vmem:[%s5080_s1 + $0x820] sm:$0xff]  ;;  %v2205_v16 = vld [vmem:[%s5080_s1 + $0x828] sm:$0xff] }
 0x881   :  { %3603 = vmatprep.subr.bf16.mxu0 %v3820_v3  ;;  %v3703_v17 = vpack.c.bf16 %v2205_v16, %v2204_v15  ;;  %v2244_v15 = vld [vmem:[%s5080_s1 + $0x940] sm:$0xff]  ;;  %v2245_v16 = vld [vmem:[%s5080_s1 + $0x948] sm:$0xff] }
 0x884   :  { %3605 = vmatpush3.bf16.msra.mxu0 %v3604_v26  ;;  %v3658_v26 = vpack.c.bf16 %v2171_v25, %v2170_v24  ;;  %v2210_v24 = vld [vmem:[%s5080_s1 + $0x850] sm:$0xff]  ;;  %v2211_v25 = vld [vmem:[%s5080_s1 + $0x858] sm:$0xff] }
 0x885   :  { %3606 = vmatprep.subr.bf16.mxu0 %v3820_v3 }
 0x888   :  { %3608 = vmatpush3.bf16.msra.mxu0 %v3607_v29  ;;  %v3661_v29 = vpack.c.bf16 %v2173_v28, %v2172_v27  ;;  %v2212_v27 = vld [vmem:[%s5080_s1 + $0x860] sm:$0xff]  ;;  %v2213_v28 = vld [vmem:[%s5080_s1 + $0x868] sm:$0xff] }
 0x889   :  { %3609 = vmatprep.subr.bf16.mxu0 %v3820_v3 }
 0x88c   :  { %3611 = vmatpush3.bf16.msra.mxu0 %v3610_v32  ;;  %v3664_v32 = vpack.c.bf16 %v2175_v31, %v2174_v30  ;;  %v2181_v30 = vld [vmem:[%s5081_s2 + $0xe] ss:$0 sm:$0xff] }
 0x88d   :  { %3612 = vmatprep.subr.bf16.mxu0 %v3820_v3 }
 0x890   :  { %3614 = vmatpush3.bf16.msra.mxu0 %v3613_v35  ;;  %v3667_v35 = vpack.c.bf16 %v2177_v34, %v2176_v33  ;;  %v2214_v34 = vld [vmem:[%s5080_s1 + $0x870] sm:$0xff] }
 0x891   :  { %3615 = vmatprep.subr.bf16.mxu0 %v3820_v3 }
 0x894   :  { %3617 = vmatpush3.bf16.msra.mxu0 %v3616_v38 }
 0x895   :  { %3618 = vmatprep.subr.bf16.mxu0 %v3820_v3 }
 0x898   :  { %3620 = vmatpush3.bf16.msra.mxu0 %v3619_v41  ;;  %v2179_v41 = vld [vmem:[%s5080_s1 + $0x778] sm:$0xff] }
 0x899   :  { %3621 = vmatprep.subr.bf16.mxu0 %v3820_v3 }
 0x89c   :  { %3623 = vmatpush3.bf16.msra.mxu0 %v3622_v48 }
 0x89d   :  { %3648 = vmatprep.subr.bf16.mxu0 %v3820_v3 }
 0x952   :  { %v1055_v43 = vpop.f32.mrb[10].mxu0 }
 0x953   :  { %v1056_v44 = vadd.f32 %v2109_v42, %v1055_v43  ;;  %v2996_v45 = vpop.f32.mrb[11].mxu0  ;;  %v3670_v42 = vpack.c.bf16 %v2179_v41, %v2178_v40  ;;  %v2182_v43 = vld [vmem:[%s5080_s1 + $0x780] sm:$0xff]  ;;  %v2221_v41 = vld [vmem:[%s5080_s1 + $0x898] sm:$0xff] }
 0x954   :  { %v2184_v45 = vld [vmem:[%s5080_s1 + $0x790] sm:$0xff] }
 0x955   :  { %3030 = vmatmul.mubr.f32.vlgmr.msra.gmra.mrb[10].mxu1 %v1056_v44  ;;  %v2183_v44 = vld [vmem:[%s5080_s1 + $0x788] sm:$0xff]  ;;  %v3676_v48 = vpack.c.bf16 %v2185_v47, %v2184_v45  ;;  %v2225_v47 = vld [vmem:[%s5080_s1 + $0x8b8] sm:$0xff] }
 0x956   :  { %3099 = vmatprep.mubr.msk.f32.mxu1 %vm3821_vm0, %v3822_v6  ;;  %3626 = vmatpush3.bf16.msra.mxu1 %v3625_v52  ;;  %v3673_v46 = vpack.c.bf16 %v2183_v44, %v2182_v43  ;;  %v2188_v52 = vld [vmem:[%s5080_s1 + $0x7b0] sm:$0xff]  ;;  %v2222_v43 = vld [vmem:[%s5080_s1 + $0x8a0] sm:$0xff]  ;;  %v2223_v44 = vld [vmem:[%s5080_s1 + $0x8a8] sm:$0xff] }
 0x957   :  { %3627 = vmatprep.subr.bf16.mxu1 %v3820_v3  ;;  %v3727_v45 = vpack.c.bf16 %v2223_v44, %v2222_v43  ;;  %v2263_v43 = vld [vmem:[%s5080_s1 + $0x9c8] sm:$0xff] }
 0x95a   :  { %3629 = vmatpush3.bf16.msra.mxu1 %v3628_v54  ;;  %v3682_v54 = vpack.c.bf16 %v2189_v53, %v2188_v52  ;;  %v2228_v52 = vld [vmem:[%s5080_s1 + $0x8d0] sm:$0xff]  ;;  %v2229_v53 = vld [vmem:[%s5080_s1 + $0x8d8] sm:$0xff] }
 0x95b   :  { %3630 = vmatprep.subr.bf16.mxu1 %v3820_v3 }
 0x95e   :  { %3632 = vmatpush3.bf16.msra.mxu1 %v3631_v57  ;;  %v3685_v57 = vpack.c.bf16 %v2191_v56, %v2190_v55  ;;  %v2230_v55 = vld [vmem:[%s5080_s1 + $0x8e0] sm:$0xff]  ;;  %v2231_v56 = vld [vmem:[%s5080_s1 + $0x8e8] sm:$0xff] }
 0x95f   :  { %3633 = vmatprep.subr.bf16.mxu1 %v3820_v3 }
 0x962   :  { %3635 = vmatpush3.bf16.msra.mxu1 %v3634_v60  ;;  %v3688_v60 = vpack.c.bf16 %v2193_v59, %v2192_v58  ;;  %v2199_v58 = vld [vmem:[%s5081_s2 + $0xf] ss:$0 sm:$0xff] }
 0x963   :  { %3636 = vmatprep.subr.bf16.mxu1 %v3820_v3 }
 0x966   :  { %3638 = vmatpush3.bf16.msra.mxu1 %v3637_v63  ;;  %v3691_v63 = vpack.c.bf16 %v2195_v62, %v2194_v61  ;;  %v2232_v62 = vld [vmem:[%s5080_s1 + $0x8f0] sm:$0xff] }
 0x967   :  { %3639 = vmatprep.subr.bf16.mxu1 %v3820_v3 }
 0x96a   :  { %3641 = vmatpush3.bf16.msra.mxu1 %v3640_v2 }
 0x96b   :  { %3642 = vmatprep.subr.bf16.mxu1 %v3820_v3 }
 0x96e   :  { %3644 = vmatpush3.bf16.msra.mxu1 %v3643_v7  ;;  %v2197_v7 = vld [vmem:[%s5080_s1 + $0x7f8] sm:$0xff] }
 0x96f   :  { %3645 = vmatprep.subr.bf16.mxu1 %v3820_v3 }
 0x972   :  { %3647 = vmatpush3.bf16.msra.mxu1 %v3646_v14 }
 0x973   :  { %3672 = vmatprep.subr.bf16.mxu1 %v3820_v3 }
 0xa28   :  { %v1150_v9 = vpop.f32.mrb[10].mxu1 }
 0xa29   :  { %v1151_v10 = vadd.f32 %v2127_v8, %v1150_v9  ;;  %v3031_v11 = vpop.f32.mrb[11].mxu1  ;;  %v3694_v8 = vpack.c.bf16 %v2197_v7, %v2196_v5  ;;  %v2200_v9 = vld [vmem:[%s5080_s1 + $0x800] sm:$0xff]  ;;  %v2239_v7 = vld [vmem:[%s5080_s1 + $0x918] sm:$0xff] }
 0xa2a   :  { %v2202_v11 = vld [vmem:[%s5080_s1 + $0x810] sm:$0xff] }
 0xa2b   :  { %3065 = vmatmul.mubr.f32.vlgmr.msra.gmra.mrb[12].mxu0 %v1151_v10  ;;  %v2201_v10 = vld [vmem:[%s5080_s1 + $0x808] sm:$0xff]  ;;  %v3700_v14 = vpack.c.bf16 %v2203_v13, %v2202_v11  ;;  %v2243_v13 = vld [vmem:[%s5080_s1 + $0x938] sm:$0xff] }
 0xa2c   :  { %3134 = vmatprep.mubr.msk.f32.mxu0 %vm3821_vm0, %v3822_v6  ;;  %3650 = vmatpush3.bf16.msra.mxu0 %v3649_v18  ;;  %v3697_v12 = vpack.c.bf16 %v2201_v10, %v2200_v9  ;;  %v2206_v18 = vld [vmem:[%s5080_s1 + $0x830] sm:$0xff]  ;;  %v2240_v9 = vld [vmem:[%s5080_s1 + $0x920] sm:$0xff]  ;;  %v2241_v10 = vld [vmem:[%s5080_s1 + $0x928] sm:$0xff] }
 0xa2d   :  { %3651 = vmatprep.subr.bf16.mxu0 %v3820_v3  ;;  %v3751_v11 = vpack.c.bf16 %v2241_v10, %v2240_v9 }
 0xa30   :  { %3653 = vmatpush3.bf16.msra.mxu0 %v3652_v20  ;;  %v3706_v20 = vpack.c.bf16 %v2207_v19, %v2206_v18  ;;  %v2246_v18 = vld [vmem:[%s5080_s1 + $0x950] sm:$0xff]  ;;  %v2247_v19 = vld [vmem:[%s5080_s1 + $0x958] sm:$0xff] }
 0xa31   :  { %3654 = vmatprep.subr.bf16.mxu0 %v3820_v3 }
 0xa34   :  { %3656 = vmatpush3.bf16.msra.mxu0 %v3655_v23  ;;  %v3709_v23 = vpack.c.bf16 %v2209_v22, %v2208_v21  ;;  %v2248_v21 = vld [vmem:[%s5080_s1 + $0x960] sm:$0xff]  ;;  %v2249_v22 = vld [vmem:[%s5080_s1 + $0x968] sm:$0xff] }
 0xa35   :  { %3657 = vmatprep.subr.bf16.mxu0 %v3820_v3 }
 0xa38   :  { %3659 = vmatpush3.bf16.msra.mxu0 %v3658_v26  ;;  %v3712_v26 = vpack.c.bf16 %v2211_v25, %v2210_v24  ;;  %v2217_v24 = vld [vmem:[%s5081_s2 + $0x10] ss:$0 sm:$0xff] }
 0xa39   :  { %3660 = vmatprep.subr.bf16.mxu0 %v3820_v3 }
 0xa3c   :  { %3662 = vmatpush3.bf16.msra.mxu0 %v3661_v29  ;;  %v3715_v29 = vpack.c.bf16 %v2213_v28, %v2212_v27  ;;  %v2250_v28 = vld [vmem:[%s5080_s1 + $0x970] sm:$0xff] }
 0xa3d   :  { %3663 = vmatprep.subr.bf16.mxu0 %v3820_v3 }
 0xa40   :  { %3665 = vmatpush3.bf16.msra.mxu0 %v3664_v32 }
 0xa41   :  { %3666 = vmatprep.subr.bf16.mxu0 %v3820_v3 }
 0xa44   :  { %3668 = vmatpush3.bf16.msra.mxu0 %v3667_v35  ;;  %v2215_v35 = vld [vmem:[%s5080_s1 + $0x878] sm:$0xff] }
 0xa45   :  { %3669 = vmatprep.subr.bf16.mxu0 %v3820_v3 }
 0xa48   :  { %3671 = vmatpush3.bf16.msra.mxu0 %v3670_v42 }
 0xa49   :  { %3696 = vmatprep.subr.bf16.mxu0 %v3820_v3 }
 0xafe   :  { %v1245_v37 = vpop.f32.mrb[12].mxu0 }
 0xaff   :  { %v1246_v38 = vadd.f32 %v2145_v36, %v1245_v37  ;;  %v3066_v39 = vpop.f32.mrb[13].mxu0  ;;  %v3718_v36 = vpack.c.bf16 %v2215_v35, %v2214_v34  ;;  %v2218_v37 = vld [vmem:[%s5080_s1 + $0x880] sm:$0xff]  ;;  %v2257_v34 = vld [vmem:[%s5080_s1 + $0x998] sm:$0xff] }
 0xb00   :  { %v2220_v39 = vld [vmem:[%s5080_s1 + $0x890] sm:$0xff] }
 0xb01   :  { %3100 = vmatmul.mubr.f32.vlgmr.msra.gmra.mrb[12].mxu1 %v1246_v38  ;;  %v2219_v38 = vld [vmem:[%s5080_s1 + $0x888] sm:$0xff]  ;;  %v3724_v42 = vpack.c.bf16 %v2221_v41, %v2220_v39  ;;  %v2260_v39 = vld [vmem:[%s5080_s1 + $0x9b0] sm:$0xff] }
 0xb02   :  { %3169 = vmatprep.mubr.msk.f32.mxu1 %vm3821_vm0, %v3822_v6  ;;  %3674 = vmatpush3.bf16.msra.mxu1 %v3673_v46  ;;  %v3721_v40 = vpack.c.bf16 %v2219_v38, %v2218_v37  ;;  %v2224_v46 = vld [vmem:[%s5080_s1 + $0x8b0] sm:$0xff]  ;;  %v2259_v37 = vld [vmem:[%s5080_s1 + $0x9a8] sm:$0xff] }
 0xb03   :  { %3675 = vmatprep.subr.bf16.mxu1 %v3820_v3 }
 0xb06   :  { %3677 = vmatpush3.bf16.msra.mxu1 %v3676_v48  ;;  %v3730_v48 = vpack.c.bf16 %v2225_v47, %v2224_v46  ;;  %v2265_v46 = vld [vmem:[%s5080_s1 + $0x9d8] sm:$0xff] }
 0xb07   :  { %3678 = vmatprep.subr.bf16.mxu1 %v3820_v3 }
 0xb0a   :  { %3680 = vmatpush3.bf16.msra.mxu1 %v3679_v51  ;;  %v3733_v51 = vpack.c.bf16 %v2227_v50, %v2226_v49  ;;  %v2267_v49 = vld [vmem:[%s5080_s1 + $0x9e8] sm:$0xff] }
 0xb0b   :  { %3681 = vmatprep.subr.bf16.mxu1 %v3820_v3 }
 0xb0e   :  { %3683 = vmatpush3.bf16.msra.mxu1 %v3682_v54  ;;  %v3736_v54 = vpack.c.bf16 %v2229_v53, %v2228_v52 }
 0xb0f   :  { %3684 = vmatprep.subr.bf16.mxu1 %v3820_v3 }
 0xb12   :  { %3686 = vmatpush3.bf16.msra.mxu1 %v3685_v57  ;;  %v3739_v57 = vpack.c.bf16 %v2231_v56, %v2230_v55  ;;  %v2268_v55 = vld [vmem:[%s5080_s1 + $0x9f0] sm:$0xff]  ;;  %v2269_v56 = vld [vmem:[%s5080_s1 + $0x9f8] sm:$0xff] }
 0xb13   :  { %3687 = vmatprep.subr.bf16.mxu1 %v3820_v3 }
 0xb16   :  { %3689 = vmatpush3.bf16.msra.mxu1 %v3688_v60 }
 0xb17   :  { %3690 = vmatprep.subr.bf16.mxu1 %v3820_v3 }
 0xb1a   :  { %3692 = vmatpush3.bf16.msra.mxu1 %v3691_v63  ;;  %v2233_v63 = vld [vmem:[%s5080_s1 + $0x8f8] sm:$0xff] }
 0xb1b   :  { %3693 = vmatprep.subr.bf16.mxu1 %v3820_v3 }
 0xb1e   :  { %3695 = vmatpush3.bf16.msra.mxu1 %v3694_v8 }
 0xb1f   :  { %3720 = vmatprep.subr.bf16.mxu1 %v3820_v3 }
 0xbd4   :  { %v1340_v1 = vpop.f32.mrb[12].mxu1 }
 0xbd5   :  { %v1341_v2 = vadd.f32 %v2163_v0, %v1340_v1  ;;  %v3101_v4 = vpop.f32.mrb[13].mxu1  ;;  %v3742_v0 = vpack.c.bf16 %v2233_v63, %v2232_v62  ;;  %v2236_v1 = vld [vmem:[%s5080_s1 + $0x900] sm:$0xff] }
 0xbd6   :  { %v2238_v4 = vld [vmem:[%s5080_s1 + $0x910] sm:$0xff] }
 0xbd7   :  { %3135 = vmatmul.mubr.f32.vlgmr.msra.gmra.mrb[14].mxu0 %v1341_v2  ;;  %v2237_v2 = vld [vmem:[%s5080_s1 + $0x908] sm:$0xff]  ;;  %v3748_v8 = vpack.c.bf16 %v2239_v7, %v2238_v4 }
 0xbd8   :  { %3204 = vmatprep.mubr.msk.f32.mxu0 %vm3821_vm0, %v3822_v6  ;;  %3698 = vmatpush3.bf16.msra.mxu0 %v3697_v12  ;;  %v3745_v5 = vpack.c.bf16 %v2237_v2, %v2236_v1  ;;  %v2242_v12 = vld [vmem:[%s5080_s1 + $0x930] sm:$0xff] }
 0xbd9   :  { %3699 = vmatprep.subr.bf16.mxu0 %v3820_v3 }
 0xbdc   :  { %3701 = vmatpush3.bf16.msra.mxu0 %v3700_v14  ;;  %v3754_v14 = vpack.c.bf16 %v2243_v13, %v2242_v12 }
 0xbdd   :  { %3702 = vmatprep.subr.bf16.mxu0 %v3820_v3 }
 0xbe0   :  { %3704 = vmatpush3.bf16.msra.mxu0 %v3703_v17  ;;  %v3757_v17 = vpack.c.bf16 %v2245_v16, %v2244_v15 }
 0xbe1   :  { %3705 = vmatprep.subr.bf16.mxu0 %v3820_v3 }
 0xbe4   :  { %3707 = vmatpush3.bf16.msra.mxu0 %v3706_v20  ;;  %v3760_v20 = vpack.c.bf16 %v2247_v19, %v2246_v18 }
 0xbe5   :  { %3708 = vmatprep.subr.bf16.mxu0 %v3820_v3 }
 0xbe8   :  { %3710 = vmatpush3.bf16.msra.mxu0 %v3709_v23  ;;  %v3763_v23 = vpack.c.bf16 %v2249_v22, %v2248_v21 }
 0xbe9   :  { %3711 = vmatprep.subr.bf16.mxu0 %v3820_v3 }
 0xbec   :  { %3713 = vmatpush3.bf16.msra.mxu0 %v3712_v26 }
 0xbed   :  { %3714 = vmatprep.subr.bf16.mxu0 %v3820_v3 }
 0xbf0   :  { %3716 = vmatpush3.bf16.msra.mxu0 %v3715_v29  ;;  %v2251_v29 = vld [vmem:[%s5080_s1 + $0x978] sm:$0xff] }
 0xbf1   :  { %3717 = vmatprep.subr.bf16.mxu0 %v3820_v3 }
 0xbf4   :  { %3719 = vmatpush3.bf16.msra.mxu0 %v3718_v36  ;;  %v2258_v36 = vld [vmem:[%s5080_s1 + $0x9a0] sm:$0xff] }
 0xbf5   :  { %3744 = vmatprep.subr.bf16.mxu0 %v3820_v3  ;;  %v3775_v38 = vpack.c.bf16 %v2259_v37, %v2258_v36 }
 0xcaa   :  { %v1435_v31 = vpop.f32.mrb[14].mxu0 }
 0xcab   :  { %v1436_v32 = vadd.f32 %v2181_v30, %v1435_v31  ;;  %v3136_v33 = vpop.f32.mrb[15].mxu0  ;;  %v3766_v30 = vpack.c.bf16 %v2251_v29, %v2250_v28  ;;  %v2254_v31 = vld [vmem:[%s5080_s1 + $0x980] sm:$0xff] }
 0xcad   :  { %3170 = vmatmul.mubr.f32.vlgmr.msra.gmra.mrb[14].mxu1 %v1436_v32  ;;  %v2255_v32 = vld [vmem:[%s5080_s1 + $0x988] sm:$0xff] }
 0xcae   :  { %3239 = vmatprep.mubr.msk.f32.mxu1 %vm3821_vm0, %v3822_v6  ;;  %3722 = vmatpush3.bf16.msra.mxu1 %v3721_v40  ;;  %v3769_v33 = vpack.c.bf16 %v2255_v32, %v2254_v31  ;;  %v2261_v40 = vld [vmem:[%s5080_s1 + $0x9b8] sm:$0xff] }
 0xcaf   :  { %3723 = vmatprep.subr.bf16.mxu1 %v3820_v3  ;;  %v3778_v41 = vpack.c.bf16 %v2261_v40, %v2260_v39 }
 0xcb2   :  { %3725 = vmatpush3.bf16.msra.mxu1 %v3724_v42  ;;  %v2262_v42 = vld [vmem:[%s5080_s1 + $0x9c0] sm:$0xff] }
 0xcb3   :  { %3726 = vmatprep.subr.bf16.mxu1 %v3820_v3  ;;  %v3781_v44 = vpack.c.bf16 %v2263_v43, %v2262_v42 }
 0xcb6   :  { %3728 = vmatpush3.bf16.msra.mxu1 %v3727_v45  ;;  %v2264_v45 = vld [vmem:[%s5080_s1 + $0x9d0] sm:$0xff] }
 0xcb7   :  { %3729 = vmatprep.subr.bf16.mxu1 %v3820_v3  ;;  %v3784_v47 = vpack.c.bf16 %v2265_v46, %v2264_v45 }
 0xcba   :  { %3731 = vmatpush3.bf16.msra.mxu1 %v3730_v48  ;;  %v2266_v48 = vld [vmem:[%s5080_s1 + $0x9e0] sm:$0xff] }
 0xcbb   :  { %3732 = vmatprep.subr.bf16.mxu1 %v3820_v3  ;;  %v3787_v50 = vpack.c.bf16 %v2267_v49, %v2266_v48 }
 0xcbe   :  { %3734 = vmatpush3.bf16.msra.mxu1 %v3733_v51  ;;  %v2235_v51 = vld [vmem:[%s5081_s2 + $0x11] ss:$0 sm:$0xff] }
 0xcbf   :  { %3735 = vmatprep.subr.bf16.mxu1 %v3820_v3 }
 0xcc2   :  { %3737 = vmatpush3.bf16.msra.mxu1 %v3736_v54 }
 0xcc3   :  { %3738 = vmatprep.subr.bf16.mxu1 %v3820_v3 }
 0xcc6   :  { %3740 = vmatpush3.bf16.msra.mxu1 %v3739_v57  ;;  %v3790_v57 = vpack.c.bf16 %v2269_v56, %v2268_v55 }
 0xcc7   :  { %3741 = vmatprep.subr.bf16.mxu1 %v3820_v3 }
 0xcca   :  { %3743 = vmatpush3.bf16.msra.mxu1 %v3742_v0 }
 0xccb   :  { %3768 = vmatprep.subr.bf16.mxu1 %v3820_v3 }
 0xd80   :  { %v1530_v59 = vpop.f32.mrb[14].mxu1 }
 0xd81   :  { %v1531_v60 = vadd.f32 %v2199_v58, %v1530_v59  ;;  %v3171_v61 = vpop.f32.mrb[15].mxu1 }
 0xd82   :  { %v2271_v61 = vld [vmem:[%s5081_s2 + $0x13] ss:$0 sm:$0xff] }
 0xd83   :  { %3205 = vmatmul.mubr.f32.vlgmr.msra.gmra.mrb[16].mxu0 %v1531_v60 }
 0xd84   :  { %3274 = vmatprep.mubr.msk.f32.mxu0 %vm3821_vm0, %v3822_v6  ;;  %3746 = vmatpush3.bf16.msra.mxu0 %v3745_v5 }
 0xd85   :  { %3747 = vmatprep.subr.bf16.mxu0 %v3820_v3 }
 0xd88   :  { %3749 = vmatpush3.bf16.msra.mxu0 %v3748_v8 }
 0xd89   :  { %3750 = vmatprep.subr.bf16.mxu0 %v3820_v3 }
 0xd8c   :  { %3752 = vmatpush3.bf16.msra.mxu0 %v3751_v11 }
 0xd8d   :  { %3753 = vmatprep.subr.bf16.mxu0 %v3820_v3 }
 0xd90   :  { %3755 = vmatpush3.bf16.msra.mxu0 %v3754_v14 }
 0xd91   :  { %3756 = vmatprep.subr.bf16.mxu0 %v3820_v3 }
 0xd94   :  { %3758 = vmatpush3.bf16.msra.mxu0 %v3757_v17 }
 0xd95   :  { %3759 = vmatprep.subr.bf16.mxu0 %v3820_v3 }
 0xd98   :  { %3761 = vmatpush3.bf16.msra.mxu0 %v3760_v20 }
 0xd99   :  { %3762 = vmatprep.subr.bf16.mxu0 %v3820_v3 }
 0xd9c   :  { %3764 = vmatpush3.bf16.msra.mxu0 %v3763_v23 }
 0xd9d   :  { %3765 = vmatprep.subr.bf16.mxu0 %v3820_v3 }
 0xda0   :  { %3767 = vmatpush3.bf16.msra.mxu0 %v3766_v30 }
 0xe56   :  { %v1625_v25 = vpop.f32.mrb[16].mxu0 }
 0xe57   :  { %v1626_v26 = vadd.f32 %v2217_v24, %v1625_v25  ;;  %v3206_v27 = vpop.f32.mrb[17].mxu0 }
 0xe59   :  { %3240 = vmatmul.mubr.f32.vlgmr.msra.gmra.mrb[16].mxu1 %v1626_v26 }
 0xe5a   :  { %3309 = vmatprep.mubr.msk.f32.mxu1 %vm3821_vm0, %v3822_v6  ;;  %v2256_v6 = vld [vmem:[%s5080_s1 + $0x990] sm:$0xff]  ;;  %3770 = vmatpush3.bf16.msra.mxu1 %v3769_v33  ;;  %s3796_s1 = scalar_lea.vmem %s1922_s24, 128 }
 0xe5b   :  { %v3772_v35 = vpack.c.bf16 %v2257_v34, %v2256_v6  ;;  %3771 = vmatprep.subr.bf16.mxu1 %v3820_v3  ;;  %p3797_p0 = scmp.ne.s32.totalorder %s1922_s24, %s3796_s1  ;;  %p3802_p2 = scmp.lt.s32.totalorder %s3796_s1, %s3796_s1 }
 0xe5d   :  { %p3803_p3 = por %p3802_p2, %p3801_p1 }
 0xe5e   :  { %3773 = vmatpush3.bf16.msra.mxu1 %v3772_v35 }
 0xe5f   :  { %3774 = vmatprep.subr.bf16.mxu1 %v3820_v3  ;;  %p3804_p4 = pnand %p3803_p3, %p3797_p0 }
 0xe62   :  { %3776 = vmatpush3.bf16.msra.mxu1 %v3775_v38 }
 0xe63   :  { %3777 = vmatprep.subr.bf16.mxu1 %v3820_v3 }
 0xe66   :  { %3779 = vmatpush3.bf16.msra.mxu1 %v3778_v41 }
 0xe67   :  { %3780 = vmatprep.subr.bf16.mxu1 %v3820_v3 }
 0xe6a   :  { %3782 = vmatpush3.bf16.msra.mxu1 %v3781_v44 }
 0xe6b   :  { %3783 = vmatprep.subr.bf16.mxu1 %v3820_v3 }
 0xe6e   :  { %3785 = vmatpush3.bf16.msra.mxu1 %v3784_v47 }
 0xe6f   :  { %3786 = vmatprep.subr.bf16.mxu1 %v3820_v3 }
 0xe72   :  { %3788 = vmatpush3.bf16.msra.mxu1 %v3787_v50 }
 0xe73   :  { %3789 = vmatprep.subr.bf16.mxu1 %v3820_v3  ;;  %v2253_v3 = vld [vmem:[%s5081_s2 + $0x12] ss:$0 sm:$0xff] }
 0xe76   :  { %3791 = vmatpush3.bf16.msra.mxu1 %v3790_v57 }
 0xf2c   :  { %v1720_v52 = vpop.f32.mrb[16].mxu1 }
 0xf2d   :  { %v1721_v53 = vadd.f32 %v2235_v51, %v1720_v52  ;;  %v3241_v54 = vpop.f32.mrb[17].mxu1 }
 0xf2f   :  { %3275 = vmatmul.mubr.f32.vlgmr.msra.gmra.mrb[18].mxu0 %v1721_v53 }
0x1002   :  { %v1815_v58 = vpop.f32.mrb[18].mxu0 }
0x1003   :  { %v1816_v59 = vadd.f32 %v2253_v3, %v1815_v58  ;;  %v3276_v60 = vpop.f32.mrb[19].mxu0 }
0x1005   :  { %3310 = vmatmul.mubr.f32.vlgmr.msra.gmra.mrb[18].mxu1 %v1816_v59 }
0x10d8   :  { %v1910_v62 = vpop.f32.mrb[18].mxu1 }
0x10d9   :  { %v1911_v63 = vadd.f32 %v2271_v61, %v1910_v62  ;;  %v3311_v0 = vpop.f32.mrb[19].mxu1 }
0x10db   :  { %1914 = vst [vmem:[#allocation2] sm:$0xff] %v1911_v63 }
0x10dc   :  { %3807 = shalt.err (!%p3804_p4)
}
0x10dd   :  { %s3808_s27 = scalar_lea.hbm %s5082_s3, 128 }
0x10de   :  { %p3809_p5 = scmp.ne.s32.totalorder %s5082_s3, %s3808_s27  ;;  %p3812_p6 = scmp.lt.u32.totalorder %s3808_s27, %s5082_s3 }
0x10e0   :  { %p3814_p7 = pnand %p3812_p6, %p3809_p5 }
0x10e2   :  { %3817 = shalt.err (!%p3814_p7)
}
0x10e3   :  { %1924 = dma.vmem_to_hbm [thread:$0]  %s1922_s24, 128, %s5082_s3, [#allocation3]  }
0x10e4   :  { %3818 = dma.done.wait [#allocation3], 128  }
0x10e5   :  { %3819 = vsyncadd [#allocation3], 4294967168 }
0x10e6   :  { %1928 = vsyncpa [#allocation3], 1 }

</bundles_post_ra>
